<compile_context>
chip_gen: v6e
topology: v6e:2x2x1
jax: 0.10.0
libtpu: 0.0.40
codegen_flags: <defaults>
</compile_context>

<pallas_src>
import math

import jax
import jax.numpy as jnp
import numpy as np
from jax.experimental import pallas as pl
from jax.experimental.pallas import tpu as pltpu


# ----------------------------- kernel helpers -----------------------------

def _layernorm(x, w, b, eps=1e-6):
    # eps=1e-6 matches the module's norm_layer = partial(nn.LayerNorm, eps=1e-06)
    mu = jnp.mean(x, axis=-1, keepdims=True)
    var = jnp.mean(jnp.square(x - mu), axis=-1, keepdims=True)
    return (x - mu) * jax.lax.rsqrt(var + eps) * w + b


def _gelu_exact(x):
    # nn.GELU default = exact erf gelu
    return 0.5 * x * (1.0 + jax.lax.erf(x * (1.0 / math.sqrt(2.0))))


def make_transformer_kernel(*, block_b, n_pad, n_valid, embed_dim, num_heads,
                            compute_dtype=jnp.bfloat16):
    N = n_pad
    C = embed_dim
    H = num_heads
    hd = C // H
    M = block_b * N
    need_mask = n_valid < n_pad

    def kernel(x_ref,
               ln1w_ref, ln1b_ref, wqkv_ref, bqkv_ref, wproj_ref, bproj_ref,
               ln2w_ref, ln2b_ref, w1_ref, b1_ref, w2_ref, b2_ref,
               nfw_ref, nfb_ref,
               out_ref):
        d = pl.program_id(1)
        last = pl.num_programs(1) - 1

        # ---- carry init: tokens (pos_embed folded host-side) ----
        @pl.when(d == 0)
        def _init():
            out_ref[...] = x_ref[...]

        x = out_ref[...]                                     # (M, C) f32 carry

        # ---------------- attention block ----------------
        h = _layernorm(x, ln1w_ref[...], ln1b_ref[...])
        # wqkv is pre-transposed host-side to (C, 3C); scale folded into Q cols
        qkv = jnp.dot(h.astype(compute_dtype), wqkv_ref[...],
                      preferred_element_type=jnp.float32) + bqkv_ref[...]
        qkv_c = qkv.astype(compute_dtype)                    # (M, 3C)

        def to_heads(t2):
            # (M, C) -> (block_b*H, N, hd): one reshape + one transpose
            t4 = t2.reshape(block_b, N, H, hd)
            return jnp.transpose(t4, (0, 2, 1, 3)).reshape(block_b * H, N, hd)

        q3 = to_heads(qkv_c[:, 0 * C:1 * C])
        k3 = to_heads(qkv_c[:, 1 * C:2 * C])
        v3 = to_heads(qkv_c[:, 2 * C:3 * C])

        # head-batched score / PV matmuls, f32 accumulation
        s = jnp.einsum('bqd,bkd->bqk', q3, k3,
                       preferred_element_type=jnp.float32)
        if need_mask:
            # padded key columns must not receive attention weight
            kcol = jax.lax.broadcasted_iota(jnp.int32, (1, 1, N), 2)
            s = s + jnp.where(kcol < n_valid, 0.0, -1e30)
        s = s - jnp.max(s, axis=-1, keepdims=True)
        p = jnp.exp(s)
        p = p * pl.reciprocal(jnp.sum(p, axis=-1, keepdims=True), approx=True)
        o3 = jnp.einsum('bqk,bkd->bqd', p.astype(compute_dtype), v3,
                        preferred_element_type=jnp.float32)  # (bB*H, N, hd)

        # back to (M, C): one transpose + reshape, then one full-size proj matmul
        o2 = jnp.transpose(o3.reshape(block_b, H, N, hd),
                           (0, 2, 1, 3)).reshape(M, C)
        proj = jnp.dot(o2.astype(compute_dtype), wproj_ref[...],
                       preferred_element_type=jnp.float32) + bproj_ref[...]
        x = x + proj

        # ---------------- MLP block ----------------
        # TODO(synk): split w1/w2 over the hidden dim on v7x to cut resident VMEM.
        h2 = _layernorm(x, ln2w_ref[...], ln2b_ref[...])
        hid = jnp.dot(h2.astype(compute_dtype), w1_ref[...],
                      preferred_element_type=jnp.float32) + b1_ref[...]
        hid = _gelu_exact(hid)
        mlp = jnp.dot(hid.astype(compute_dtype), w2_ref[...],
                      preferred_element_type=jnp.float32) + b2_ref[...]
        x = x + mlp

        # ---- write carry / final LayerNorm ----
        @pl.when(d < last)
        def _carry():
            out_ref[...] = x

        @pl.when(d == last)
        def _final():
            out_ref[...] = _layernorm(x, nfw_ref[...],
                                      nfb_ref[...]).astype(out_ref.dtype)

    return kernel


# ----------------------------- wrapper -----------------------------

def transformer_forward(x, pos_embed, params, *, depth, num_heads,
                        block_b=None, target_m=512, weight_dtype=jnp.bfloat16):
    B, N, C = x.shape
    H = num_heads
    assert C % H == 0
    hd = C // H
    hidden = params["w1"].shape[1]
    f32 = jnp.float32
    scale = hd ** -0.5

    # sublane-align the token count host-side (padded keys masked in-kernel)
    n_pad = ((N + 7) // 8) * 8

    # pack batches so the matmul M dim is large enough to hide the per-layer
    # weight stream (target_m ~768-1024 on v6e, ~384-512 on v7x, >=256 on v5e)
    if block_b is None:
        block_b = 1
        for cand in range(1, B + 1):
            if B % cand == 0 and cand * n_pad <= max(target_m, n_pad):
                block_b = cand
    assert B % block_b == 0, "block_b must divide the batch size"
    M = block_b * n_pad

    kernel = make_transformer_kernel(block_b=block_b, n_pad=n_pad, n_valid=N,
                                     embed_dim=C, num_heads=H)

    # per-layer weight spec: leading depth dim squeezed, block index = layer d
    def wspec(r, c):
        return pl.BlockSpec((pl.Squeezed(), r, c), lambda b, d: (d, 0, 0))

    in_specs = [
        pl.BlockSpec((M, C), lambda b, d: (b, 0)),   # tokens (read at d==0)
        wspec(1, C), wspec(1, C),                    # ln1 w, b
        wspec(C, 3 * C), wspec(1, 3 * C),            # wqkv (pre-T, scaled), bqkv
        wspec(C, C), wspec(1, C),                    # wproj (pre-T), bproj
        wspec(1, C), wspec(1, C),                    # ln2 w, b
        wspec(C, hidden), wspec(1, hidden),          # w1 (pre-T), b1
        wspec(hidden, C), wspec(1, C),               # w2 (pre-T), b2
        pl.BlockSpec((1, C), lambda b, d: (0, 0)),   # final norm w
        pl.BlockSpec((1, C), lambda b, d: (0, 0)),   # final norm b
    ]
    # output block index constant over depth -> resident f32 carry
    out_spec = pl.BlockSpec((M, C), lambda b, d: (b, 0))

    # advisory cost estimate for the XLA scheduler
    steps = (B // block_b) * depth
    flops_step = (2 * M * C * 3 * C + 2 * M * C * C + 4 * M * C * hidden
                  + 4 * block_b * H * n_pad * n_pad * hd)
    trans_step = block_b * H * n_pad * n_pad + M * hidden
    w_bytes = 2 * (3 * C * C + C * C + 2 * C * hidden) + 4 * (8 * C + hidden)
    cost = pl.CostEstimate(
        flops=int(steps * flops_step),
        transcendentals=int(steps * trans_step),
        bytes_accessed=int(steps * w_bytes + 2 * B * n_pad * C * 4))

    # VMEM estimate: double-buffered layer params + token blocks + f32 temps
    est = (2 * w_bytes + 3 * M * C * 4
           + 4 * (M * 3 * C + 2 * M * hidden + block_b * H * n_pad * n_pad
                  + 6 * M * C))
    vmem_limit = int(min(100 << 20, max(32 << 20, 2 * est)))

    fn = pl.pallas_call(
        kernel,
        out_shape=jax.ShapeDtypeStruct((B * n_pad, C), f32),
        grid_spec=pltpu.PrefetchScalarGridSpec(
            num_scalar_prefetch=0,
            grid=(B // block_b, depth),            # depth last => carried axis
            in_specs=in_specs,
            out_specs=out_spec),
        input_output_aliases={0: 0},               # tokens buffer reused as output
        compiler_params=pltpu.CompilerParams(
            dimension_semantics=("parallel", "arbitrary"),
            vmem_limit_bytes=vmem_limit),
        cost_estimate=cost,
    )

    def run(x, pos_embed, params):
        # fold pos_embed + pad tokens outside the kernel (cheap fused XLA ops)
        xf = x.astype(f32) + pos_embed.astype(f32)
        if n_pad != N:
            xf = jnp.pad(xf, ((0, 0), (0, n_pad - N), (0, 0)))
        x2 = xf.reshape(B * n_pad, C)

        # pre-transpose weights (PyTorch Linear is (out,in)), cast to bf16,
        # fold 1/sqrt(head_dim) into the Q slice of wqkv / bqkv
        qscale = jnp.concatenate([jnp.full((C,), scale, f32),
                                  jnp.ones((2 * C,), f32)])
        wqkv_t = (jnp.swapaxes(params["wqkv"], 1, 2) * qscale).astype(weight_dtype)
        bqkv = (params["bqkv"].astype(f32) * qscale).reshape(depth, 1, 3 * C)
        wproj_t = jnp.swapaxes(params["wproj"], 1, 2).astype(weight_dtype)
        w1_t = jnp.swapaxes(params["w1"], 1, 2).astype(weight_dtype)
        w2_t = jnp.swapaxes(params["w2"], 1, 2).astype(weight_dtype)
        vec = lambda a: a.reshape(depth, 1, -1).astype(f32)
        ln1w, ln1b = vec(params["ln1_w"]), vec(params["ln1_b"])
        ln2w, ln2b = vec(params["ln2_w"]), vec(params["ln2_b"])
        bproj, b1, b2 = vec(params["bproj"]), vec(params["b1"]), vec(params["b2"])
        nfw = params["normf_w"].reshape(1, C).astype(f32)
        nfb = params["normf_b"].reshape(1, C).astype(f32)

        out2 = fn(x2, ln1w, ln1b, wqkv_t, bqkv, wproj_t, bproj,
                  ln2w, ln2b, w1_t, b1, w2_t, b2, nfw, nfb)
        return out2.reshape(B, n_pad, C)[:, :N, :].astype(x.dtype)

    return jax.jit(run)(x, pos_embed, params)


# ----------------------------- reference (plain JAX, f32) -----------------------------

def transformer_reference(x, pos_embed, params, *, depth, num_heads):
    def ln(z, w, b, eps=1e-6):
        mu = z.mean(-1, keepdims=True)
        var = ((z - mu) ** 2).mean(-1, keepdims=True)
        return (z - mu) / jnp.sqrt(var + eps) * w + b

    B, N, C = x.shape
    hd = C // num_heads
    x = x + pos_embed
    for d in range(depth):
        h_in = ln(x, params["ln1_w"][d], params["ln1_b"][d])
        qkv = h_in @ params["wqkv"][d].T + params["bqkv"][d]
        qkv = qkv.reshape(B, N, 3, num_heads, hd).transpose(2, 0, 3, 1, 4)
        q, k, v = qkv[0], qkv[1], qkv[2]
        s = (q @ jnp.swapaxes(k, -1, -2)) * (hd ** -0.5)
        p = jax.nn.softmax(s, axis=-1)
        o = (p @ v).transpose(0, 2, 1, 3).reshape(B, N, C)
        x = x + o @ params["wproj"][d].T + params["bproj"][d]

        h_in = ln(x, params["ln2_w"][d], params["ln2_b"][d])
        hid = jax.nn.gelu(h_in @ params["w1"][d].T + params["b1"][d],
                          approximate=False)
        x = x + hid @ params["w2"][d].T + params["b2"][d]
    return ln(x, params["normf_w"][0], params["normf_b"][0])


# ----------------------------- main -----------------------------

if __name__ == "__main__":
    # Small config consistent with the module (embed_dim % num_heads == 0,
    # mlp_ratio = 2.0):
    B, N, C = 2, 8, 32
    depth, num_heads = 2, 4
    hidden = int(C * 2.0)
    dtype = jnp.float32

    key = jax.random.PRNGKey(0)
    ks = jax.random.split(key, 8)

    x = jax.random.normal(ks[0], (B, N, C), dtype)
    pos_embed = 0.02 * jax.random.normal(ks[1], (1, N, C), dtype)

    def q_bf16(a):
        # round matmul weights to bf16 once so kernel and reference use
        # numerically identical weight values
        return a.astype(jnp.bfloat16).astype(jnp.float32)

    # Deterministic synthetic parameters (PyTorch Linear convention: W is (out, in)).
    params = {
        "ln1_w":  jnp.ones((depth, C), dtype),
        "ln1_b":  jnp.zeros((depth, C), dtype),
        "wqkv":   q_bf16(0.02 * jax.random.normal(ks[2], (depth, 3 * C, C), dtype)),
        "bqkv":   jnp.zeros((depth, 3 * C), dtype),
        "wproj":  q_bf16(0.02 * jax.random.normal(ks[3], (depth, C, C), dtype)),
        "bproj":  jnp.zeros((depth, C), dtype),
        "ln2_w":  jnp.ones((depth, C), dtype),
        "ln2_b":  jnp.zeros((depth, C), dtype),
        "w1":     q_bf16(0.02 * jax.random.normal(ks[4], (depth, hidden, C), dtype)),
        "b1":     1e-6 * jax.random.normal(ks[5], (depth, hidden), dtype),
        "w2":     q_bf16(0.02 * jax.random.normal(ks[6], (depth, C, hidden), dtype)),
        "b2":     1e-6 * jax.random.normal(ks[7], (depth, C), dtype),
        "normf_w": jnp.ones((1, C), dtype),
        "normf_b": jnp.zeros((1, C), dtype),
    }

    out = transformer_forward(x, pos_embed, params,
                              depth=depth, num_heads=num_heads)
    out = jax.block_until_ready(out)

    ref = transformer_reference(x, pos_embed, params,
                                depth=depth, num_heads=num_heads)
    # tolerance covers bf16 MXU operands, the scale folded into bf16 Q weights,
    # and the approximate-reciprocal softmax denominator
    np.testing.assert_allclose(np.asarray(out), np.asarray(ref),
                               rtol=1e-2, atol=1e-2)

    print("KERNEL_OK")
</pallas_src>

<mosaic_0001>
module attributes {stable_mosaic.version = 11 : i64} {
  func.func @kernel(%arg0: i32, %arg1: i32, %arg2: memref<16x32xf32, #tpu.memory_space<vmem>>, %arg3: memref<1x1x32xf32, #tpu.memory_space<vmem>>, %arg4: memref<1x1x32xf32, #tpu.memory_space<vmem>>, %arg5: memref<1x32x96xbf16, #tpu.memory_space<vmem>>, %arg6: memref<1x1x96xf32, #tpu.memory_space<vmem>>, %arg7: memref<1x32x32xbf16, #tpu.memory_space<vmem>>, %arg8: memref<1x1x32xf32, #tpu.memory_space<vmem>>, %arg9: memref<1x1x32xf32, #tpu.memory_space<vmem>>, %arg10: memref<1x1x32xf32, #tpu.memory_space<vmem>>, %arg11: memref<1x32x64xbf16, #tpu.memory_space<vmem>>, %arg12: memref<1x1x64xf32, #tpu.memory_space<vmem>>, %arg13: memref<1x64x32xbf16, #tpu.memory_space<vmem>>, %arg14: memref<1x1x32xf32, #tpu.memory_space<vmem>>, %arg15: memref<1x32xf32, #tpu.memory_space<vmem>>, %arg16: memref<1x32xf32, #tpu.memory_space<vmem>>, %arg17: memref<16x32xf32, #tpu.memory_space<vmem>>) attributes {dimension_semantics = [#tpu.dimension_semantics<parallel>, #tpu.dimension_semantics<arbitrary>], iteration_bounds = array<i64: 1, 2>, scalar_prefetch = 0 : i64, scratch_operands = 0 : i64, tpu.core_type = #tpu.core_type<tc>, window_params = [{transform_indices = @transform_0, window_bounds = array<i64: 16, 32>}, {transform_indices = @transform_1, window_bounds = array<i64: 1, 1, 32>}, {transform_indices = @transform_2, window_bounds = array<i64: 1, 1, 32>}, {transform_indices = @transform_3, window_bounds = array<i64: 1, 32, 96>}, {transform_indices = @transform_4, window_bounds = array<i64: 1, 1, 96>}, {transform_indices = @transform_5, window_bounds = array<i64: 1, 32, 32>}, {transform_indices = @transform_6, window_bounds = array<i64: 1, 1, 32>}, {transform_indices = @transform_7, window_bounds = array<i64: 1, 1, 32>}, {transform_indices = @transform_8, window_bounds = array<i64: 1, 1, 32>}, {transform_indices = @transform_9, window_bounds = array<i64: 1, 32, 64>}, {transform_indices = @transform_10, window_bounds = array<i64: 1, 1, 64>}, {transform_indices = @transform_11, window_bounds = array<i64: 1, 64, 32>}, {transform_indices = @transform_12, window_bounds = array<i64: 1, 1, 32>}, {pipeline_mode = #tpu.pipeline_mode<synchronous>, transform_indices = @transform_13, window_bounds = array<i64: 1, 32>}, {pipeline_mode = #tpu.pipeline_mode<synchronous>, transform_indices = @transform_14, window_bounds = array<i64: 1, 32>}, {transform_indices = @transform_15, window_bounds = array<i64: 16, 32>}]} {
    %c0_i32 = arith.constant 0 : i32
    %0 = arith.cmpi eq, %arg1, %c0_i32 : i32
    %1 = arith.extui %0 : i1 to i32
    %c0_i32_0 = arith.constant 0 : i32
    %2 = arith.cmpi ne, %1, %c0_i32_0 : i32
    scf.if %2 {
      %c0_61 = arith.constant 0 : index
      %c0_62 = arith.constant 0 : index
      %133 = vector.load %arg2[%c0_61, %c0_62] : memref<16x32xf32, #tpu.memory_space<vmem>>, vector<16x32xf32>
      %c0_63 = arith.constant 0 : index
      %c0_64 = arith.constant 0 : index
      %134 = vector.load %arg17[%c0_63, %c0_64] : memref<16x32xf32, #tpu.memory_space<vmem>>, vector<16x32xf32>
      tpu.vector_store %arg17[%c0_63, %c0_64], %133 {strides = array<i32>} : memref<16x32xf32, #tpu.memory_space<vmem>>, vector<16x32xf32>,
    } else {
    }
    %c0 = arith.constant 0 : index
    %c0_1 = arith.constant 0 : index
    %3 = vector.load %arg17[%c0, %c0_1] : memref<16x32xf32, #tpu.memory_space<vmem>>, vector<16x32xf32>
    %c0_2 = arith.constant 0 : index
    %c0_3 = arith.constant 0 : index
    %c0_4 = arith.constant 0 : index
    %4 = vector.load %arg3[%c0_2, %c0_3, %c0_4] : memref<1x1x32xf32, #tpu.memory_space<vmem>>, vector<1x1x32xf32>
    %5 = vector.shape_cast %4 : vector<1x1x32xf32> to vector<1x32xf32>
    %c0_5 = arith.constant 0 : index
    %c0_6 = arith.constant 0 : index
    %c0_7 = arith.constant 0 : index
    %6 = vector.load %arg4[%c0_5, %c0_6, %c0_7] : memref<1x1x32xf32, #tpu.memory_space<vmem>>, vector<1x1x32xf32>
    %7 = vector.shape_cast %6 : vector<1x1x32xf32> to vector<1x32xf32>
    %cst = arith.constant dense<0.000000e+00> : vector<16xf32>
    %8 = vector.multi_reduction <add>, %3, %cst [1] : vector<16x32xf32> to vector<16xf32>
    %9 = vector.shape_cast %8 : vector<16xf32> to vector<16x1xf32>
    %cst_8 = arith.constant 3.200000e+01 : f32
    %10 = vector.broadcast %cst_8 : f32 to vector<16x1xf32>
    %11 = arith.divf %9, %10 : vector<16x1xf32>
    %12 = vector.broadcast %11 : vector<16x1xf32> to vector<16x32xf32>
    %13 = arith.subf %3, %12 : vector<16x32xf32>
    %14 = arith.mulf %13, %13 : vector<16x32xf32>
    %cst_9 = arith.constant dense<0.000000e+00> : vector<16xf32>
    %15 = vector.multi_reduction <add>, %14, %cst_9 [1] : vector<16x32xf32> to vector<16xf32>
    %16 = vector.shape_cast %15 : vector<16xf32> to vector<16x1xf32>
    %cst_10 = arith.constant 3.200000e+01 : f32
    %17 = vector.broadcast %cst_10 : f32 to vector<16x1xf32>
    %18 = arith.divf %16, %17 : vector<16x1xf32>
    %19 = vector.broadcast %11 : vector<16x1xf32> to vector<16x32xf32>
    %20 = arith.subf %3, %19 : vector<16x32xf32>
    %cst_11 = arith.constant 9.99999997E-7 : f32
    %21 = vector.broadcast %cst_11 : f32 to vector<16x1xf32>
    %22 = arith.addf %18, %21 : vector<16x1xf32>
    %23 = math.rsqrt %22 : vector<16x1xf32>
    %24 = vector.broadcast %23 : vector<16x1xf32> to vector<16x32xf32>
    %25 = arith.mulf %20, %24 : vector<16x32xf32>
    %26 = vector.broadcast %5 : vector<1x32xf32> to vector<16x32xf32>
    %27 = arith.mulf %25, %26 : vector<16x32xf32>
    %28 = vector.broadcast %7 : vector<1x32xf32> to vector<16x32xf32>
    %29 = arith.addf %27, %28 : vector<16x32xf32>
    %30 = arith.truncf %29 : vector<16x32xf32> to vector<16x32xbf16>
    %c0_12 = arith.constant 0 : index
    %c0_13 = arith.constant 0 : index
    %c0_14 = arith.constant 0 : index
    %31 = vector.load %arg5[%c0_12, %c0_13, %c0_14] : memref<1x32x96xbf16, #tpu.memory_space<vmem>>, vector<1x32x96xbf16>
    %32 = vector.shape_cast %31 : vector<1x32x96xbf16> to vector<32x96xbf16>
    %cst_15 = arith.constant dense<0.000000e+00> : vector<16x96xf32>
    %33 = tpu.matmul %30, %32, %cst_15 {dimension_numbers = #tpu.dot_dimension_numbers<[1], [0], [0], [1], [0, 0, 1, 1], [], []>} : vector<16x32xbf16>, vector<32x96xbf16>, vector<16x96xf32> -> vector<16x96xf32>
    %c0_16 = arith.constant 0 : index
    %c0_17 = arith.constant 0 : index
    %c0_18 = arith.constant 0 : index
    %34 = vector.load %arg6[%c0_16, %c0_17, %c0_18] : memref<1x1x96xf32, #tpu.memory_space<vmem>>, vector<1x1x96xf32>
    %35 = vector.shape_cast %34 : vector<1x1x96xf32> to vector<1x96xf32>
    %36 = vector.broadcast %35 : vector<1x96xf32> to vector<16x96xf32>
    %37 = arith.addf %33, %36 : vector<16x96xf32>
    %38 = arith.truncf %37 : vector<16x96xf32> to vector<16x96xbf16>
    %39 = vector.extract_strided_slice %38 {offsets = [0, 0], sizes = [16, 32], strides = [1, 1]} : vector<16x96xbf16> to vector<16x32xbf16>
    %40 = vector.shape_cast %39 : vector<16x32xbf16> to vector<2x8x4x8xbf16>
    %41 = tpu.transpose %40, [0, 2, 1, 3] : vector<2x8x4x8xbf16> -> vector<2x4x8x8xbf16>
    %42 = vector.shape_cast %41 : vector<2x4x8x8xbf16> to vector<8x8x8xbf16>
    %43 = vector.extract_strided_slice %38 {offsets = [0, 32], sizes = [16, 32], strides = [1, 1]} : vector<16x96xbf16> to vector<16x32xbf16>
    %44 = vector.shape_cast %43 : vector<16x32xbf16> to vector<2x8x4x8xbf16>
    %45 = tpu.transpose %44, [0, 2, 1, 3] : vector<2x8x4x8xbf16> -> vector<2x4x8x8xbf16>
    %46 = vector.shape_cast %45 : vector<2x4x8x8xbf16> to vector<8x8x8xbf16>
    %47 = vector.extract_strided_slice %38 {offsets = [0, 64], sizes = [16, 32], strides = [1, 1]} : vector<16x96xbf16> to vector<16x32xbf16>
    %48 = vector.shape_cast %47 : vector<16x32xbf16> to vector<2x8x4x8xbf16>
    %49 = tpu.transpose %48, [0, 2, 1, 3] : vector<2x8x4x8xbf16> -> vector<2x4x8x8xbf16>
    %50 = vector.shape_cast %49 : vector<2x4x8x8xbf16> to vector<8x8x8xbf16>
    "tpu.trace_start"() <{level = 10 : i32, message = "bqd,bkd->bqk"}> : () -> ()
    %cst_19 = arith.constant dense<0.000000e+00> : vector<8x8x8xf32>
    %51 = tpu.matmul %42, %46, %cst_19 {dimension_numbers = #tpu.dot_dimension_numbers<[2], [2], [1], [1], [0, 0, 0, 1, 1, 1], [0], [0]>} : vector<8x8x8xbf16>, vector<8x8x8xbf16>, vector<8x8x8xf32> -> vector<8x8x8xf32>
    "tpu.trace_stop"() : () -> ()
    %cst_20 = arith.constant dense<0xFF800000> : vector<8x8xf32>
    %52 = vector.multi_reduction <maximumf>, %51, %cst_20 [2] : vector<8x8x8xf32> to vector<8x8xf32>
    %53 = vector.shape_cast %52 : vector<8x8xf32> to vector<8x8x1xf32>
    %54 = vector.broadcast %53 : vector<8x8x1xf32> to vector<8x8x8xf32>
    %55 = arith.subf %51, %54 : vector<8x8x8xf32>
    %56 = math.exp %55 : vector<8x8x8xf32>
    %cst_21 = arith.constant dense<0.000000e+00> : vector<8x8xf32>
    %57 = vector.multi_reduction <add>, %56, %cst_21 [2] : vector<8x8x8xf32> to vector<8x8xf32>
    %58 = vector.shape_cast %57 : vector<8x8xf32> to vector<8x8x1xf32>
    %59 = tpu.reciprocal %58 {approx = true} : vector<8x8x1xf32> -> vector<8x8x1xf32>
    %60 = vector.broadcast %59 : vector<8x8x1xf32> to vector<8x8x8xf32>
    %61 = arith.mulf %56, %60 : vector<8x8x8xf32>
    %62 = arith.truncf %61 : vector<8x8x8xf32> to vector<8x8x8xbf16>
    "tpu.trace_start"() <{level = 10 : i32, message = "bqk,bkd->bqd"}> : () -> ()
    %cst_22 = arith.constant dense<0.000000e+00> : vector<8x8x8xf32>
    %63 = tpu.matmul %62, %50, %cst_22 {dimension_numbers = #tpu.dot_dimension_numbers<[2], [1], [1], [2], [0, 0, 0, 1, 1, 2], [0], [0]>} : vector<8x8x8xbf16>, vector<8x8x8xbf16>, vector<8x8x8xf32> -> vector<8x8x8xf32>
    "tpu.trace_stop"() : () -> ()
    %64 = vector.shape_cast %63 : vector<8x8x8xf32> to vector<2x4x8x8xf32>
    %65 = tpu.transpose %64, [0, 2, 1, 3] : vector<2x4x8x8xf32> -> vector<2x8x4x8xf32>
    %66 = vector.shape_cast %65 : vector<2x8x4x8xf32> to vector<16x32xf32>
    %67 = arith.truncf %66 : vector<16x32xf32> to vector<16x32xbf16>
    %c0_23 = arith.constant 0 : index
    %c0_24 = arith.constant 0 : index
    %c0_25 = arith.constant 0 : index
    %68 = vector.load %arg7[%c0_23, %c0_24, %c0_25] : memref<1x32x32xbf16, #tpu.memory_space<vmem>>, vector<1x32x32xbf16>
    %69 = vector.shape_cast %68 : vector<1x32x32xbf16> to vector<32x32xbf16>
    %cst_26 = arith.constant dense<0.000000e+00> : vector<16x32xf32>
    %70 = tpu.matmul %67, %69, %cst_26 {dimension_numbers = #tpu.dot_dimension_numbers<[1], [0], [0], [1], [0, 0, 1, 1], [], []>} : vector<16x32xbf16>, vector<32x32xbf16>, vector<16x32xf32> -> vector<16x32xf32>
    %c0_27 = arith.constant 0 : index
    %c0_28 = arith.constant 0 : index
    %c0_29 = arith.constant 0 : index
    %71 = vector.load %arg8[%c0_27, %c0_28, %c0_29] : memref<1x1x32xf32, #tpu.memory_space<vmem>>, vector<1x1x32xf32>
    %72 = vector.shape_cast %71 : vector<1x1x32xf32> to vector<1x32xf32>
    %73 = vector.broadcast %72 : vector<1x32xf32> to vector<16x32xf32>
    %74 = arith.addf %70, %73 : vector<16x32xf32>
    %75 = arith.addf %3, %74 : vector<16x32xf32>
    %c0_30 = arith.constant 0 : index
    %c0_31 = arith.constant 0 : index
    %c0_32 = arith.constant 0 : index
    %76 = vector.load %arg9[%c0_30, %c0_31, %c0_32] : memref<1x1x32xf32, #tpu.memory_space<vmem>>, vector<1x1x32xf32>
    %77 = vector.shape_cast %76 : vector<1x1x32xf32> to vector<1x32xf32>
    %c0_33 = arith.constant 0 : index
    %c0_34 = arith.constant 0 : index
    %c0_35 = arith.constant 0 : index
    %78 = vector.load %arg10[%c0_33, %c0_34, %c0_35] : memref<1x1x32xf32, #tpu.memory_space<vmem>>, vector<1x1x32xf32>
    %79 = vector.shape_cast %78 : vector<1x1x32xf32> to vector<1x32xf32>
    %cst_36 = arith.constant dense<0.000000e+00> : vector<16xf32>
    %80 = vector.multi_reduction <add>, %75, %cst_36 [1] : vector<16x32xf32> to vector<16xf32>
    %81 = vector.shape_cast %80 : vector<16xf32> to vector<16x1xf32>
    %cst_37 = arith.constant 3.200000e+01 : f32
    %82 = vector.broadcast %cst_37 : f32 to vector<16x1xf32>
    %83 = arith.divf %81, %82 : vector<16x1xf32>
    %84 = vector.broadcast %83 : vector<16x1xf32> to vector<16x32xf32>
    %85 = arith.subf %75, %84 : vector<16x32xf32>
    %86 = arith.mulf %85, %85 : vector<16x32xf32>
    %cst_38 = arith.constant dense<0.000000e+00> : vector<16xf32>
    %87 = vector.multi_reduction <add>, %86, %cst_38 [1] : vector<16x32xf32> to vector<16xf32>
    %88 = vector.shape_cast %87 : vector<16xf32> to vector<16x1xf32>
    %cst_39 = arith.constant 3.200000e+01 : f32
    %89 = vector.broadcast %cst_39 : f32 to vector<16x1xf32>
    %90 = arith.divf %88, %89 : vector<16x1xf32>
    %91 = vector.broadcast %83 : vector<16x1xf32> to vector<16x32xf32>
    %92 = arith.subf %75, %91 : vector<16x32xf32>
    %cst_40 = arith.constant 9.99999997E-7 : f32
    %93 = vector.broadcast %cst_40 : f32 to vector<16x1xf32>
    %94 = arith.addf %90, %93 : vector<16x1xf32>
    %95 = math.rsqrt %94 : vector<16x1xf32>
    %96 = vector.broadcast %95 : vector<16x1xf32> to vector<16x32xf32>
    %97 = arith.mulf %92, %96 : vector<16x32xf32>
    %98 = vector.broadcast %77 : vector<1x32xf32> to vector<16x32xf32>
    %99 = arith.mulf %97, %98 : vector<16x32xf32>
    %100 = vector.broadcast %79 : vector<1x32xf32> to vector<16x32xf32>
    %101 = arith.addf %99, %100 : vector<16x32xf32>
    %102 = arith.truncf %101 : vector<16x32xf32> to vector<16x32xbf16>
    %c0_41 = arith.constant 0 : index
    %c0_42 = arith.constant 0 : index
    %c0_43 = arith.constant 0 : index
    %103 = vector.load %arg11[%c0_41, %c0_42, %c0_43] : memref<1x32x64xbf16, #tpu.memory_space<vmem>>, vector<1x32x64xbf16>
    %104 = vector.shape_cast %103 : vector<1x32x64xbf16> to vector<32x64xbf16>
    %cst_44 = arith.constant dense<0.000000e+00> : vector<16x64xf32>
    %105 = tpu.matmul %102, %104, %cst_44 {dimension_numbers = #tpu.dot_dimension_numbers<[1], [0], [0], [1], [0, 0, 1, 1], [], []>} : vector<16x32xbf16>, vector<32x64xbf16>, vector<16x64xf32> -> vector<16x64xf32>
    %c0_45 = arith.constant 0 : index
    %c0_46 = arith.constant 0 : index
    %c0_47 = arith.constant 0 : index
    %106 = vector.load %arg12[%c0_45, %c0_46, %c0_47] : memref<1x1x64xf32, #tpu.memory_space<vmem>>, vector<1x1x64xf32>
    %107 = vector.shape_cast %106 : vector<1x1x64xf32> to vector<1x64xf32>
    %108 = vector.broadcast %107 : vector<1x64xf32> to vector<16x64xf32>
    %109 = arith.addf %105, %108 : vector<16x64xf32>
    %cst_48 = arith.constant 5.000000e-01 : f32
    %110 = vector.broadcast %cst_48 : f32 to vector<16x64xf32>
    %111 = arith.mulf %110, %109 : vector<16x64xf32>
    %cst_49 = arith.constant 0.707106769 : f32
    %112 = vector.broadcast %cst_49 : f32 to vector<16x64xf32>
    %113 = arith.mulf %109, %112 : vector<16x64xf32>
    %114 = math.erf %113 : vector<16x64xf32>
    %cst_50 = arith.constant 1.000000e+00 : f32
    %115 = vector.broadcast %cst_50 : f32 to vector<16x64xf32>
    %116 = arith.addf %115, %114 : vector<16x64xf32>
    %117 = arith.mulf %111, %116 : vector<16x64xf32>
    %118 = arith.truncf %117 : vector<16x64xf32> to vector<16x64xbf16>
    %c0_51 = arith.constant 0 : index
    %c0_52 = arith.constant 0 : index
    %c0_53 = arith.constant 0 : index
    %119 = vector.load %arg13[%c0_51, %c0_52, %c0_53] : memref<1x64x32xbf16, #tpu.memory_space<vmem>>, vector<1x64x32xbf16>
    %120 = vector.shape_cast %119 : vector<1x64x32xbf16> to vector<64x32xbf16>
    %cst_54 = arith.constant dense<0.000000e+00> : vector<16x32xf32>
    %121 = tpu.matmul %118, %120, %cst_54 {dimension_numbers = #tpu.dot_dimension_numbers<[1], [0], [0], [1], [0, 0, 1, 1], [], []>} : vector<16x64xbf16>, vector<64x32xbf16>, vector<16x32xf32> -> vector<16x32xf32>
    %c0_55 = arith.constant 0 : index
    %c0_56 = arith.constant 0 : index
    %c0_57 = arith.constant 0 : index
    %122 = vector.load %arg14[%c0_55, %c0_56, %c0_57] : memref<1x1x32xf32, #tpu.memory_space<vmem>>, vector<1x1x32xf32>
    %123 = vector.shape_cast %122 : vector<1x1x32xf32> to vector<1x32xf32>
    %124 = vector.broadcast %123 : vector<1x32xf32> to vector<16x32xf32>
    %125 = arith.addf %121, %124 : vector<16x32xf32>
    %126 = arith.addf %75, %125 : vector<16x32xf32>
    %c1_i32 = arith.constant 1 : i32
    %127 = arith.cmpi slt, %arg1, %c1_i32 : i32
    %128 = arith.extui %127 : i1 to i32
    %c0_i32_58 = arith.constant 0 : i32
    %129 = arith.cmpi ne, %128, %c0_i32_58 : i32
    scf.if %129 {
      %c0_61 = arith.constant 0 : index
      %c0_62 = arith.constant 0 : index
      %133 = vector.load %arg17[%c0_61, %c0_62] : memref<16x32xf32, #tpu.memory_space<vmem>>, vector<16x32xf32>
      tpu.vector_store %arg17[%c0_61, %c0_62], %126 {strides = array<i32>} : memref<16x32xf32, #tpu.memory_space<vmem>>, vector<16x32xf32>,
    } else {
    }
    %c1_i32_59 = arith.constant 1 : i32
    %130 = arith.cmpi eq, %arg1, %c1_i32_59 : i32
    %131 = arith.extui %130 : i1 to i32
    %c0_i32_60 = arith.constant 0 : i32
    %132 = arith.cmpi ne, %131, %c0_i32_60 : i32
    scf.if %132 {
      %c0_61 = arith.constant 0 : index
      %c0_62 = arith.constant 0 : index
      %133 = vector.load %arg15[%c0_61, %c0_62] : memref<1x32xf32, #tpu.memory_space<vmem>>, vector<1x32xf32>
      %c0_63 = arith.constant 0 : index
      %c0_64 = arith.constant 0 : index
      %134 = vector.load %arg16[%c0_63, %c0_64] : memref<1x32xf32, #tpu.memory_space<vmem>>, vector<1x32xf32>
      %cst_65 = arith.constant dense<0.000000e+00> : vector<16xf32>
      %135 = vector.multi_reduction <add>, %126, %cst_65 [1] : vector<16x32xf32> to vector<16xf32>
      %136 = vector.shape_cast %135 : vector<16xf32> to vector<16x1xf32>
      %cst_66 = arith.constant 3.200000e+01 : f32
      %137 = vector.broadcast %cst_66 : f32 to vector<16x1xf32>
      %138 = arith.divf %136, %137 : vector<16x1xf32>
      %139 = vector.broadcast %138 : vector<16x1xf32> to vector<16x32xf32>
      %140 = arith.subf %126, %139 : vector<16x32xf32>
      %141 = arith.mulf %140, %140 : vector<16x32xf32>
      %cst_67 = arith.constant dense<0.000000e+00> : vector<16xf32>
      %142 = vector.multi_reduction <add>, %141, %cst_67 [1] : vector<16x32xf32> to vector<16xf32>
      %143 = vector.shape_cast %142 : vector<16xf32> to vector<16x1xf32>
      %cst_68 = arith.constant 3.200000e+01 : f32
      %144 = vector.broadcast %cst_68 : f32 to vector<16x1xf32>
      %145 = arith.divf %143, %144 : vector<16x1xf32>
      %146 = vector.broadcast %138 : vector<16x1xf32> to vector<16x32xf32>
      %147 = arith.subf %126, %146 : vector<16x32xf32>
      %cst_69 = arith.constant 9.99999997E-7 : f32
      %148 = vector.broadcast %cst_69 : f32 to vector<16x1xf32>
      %149 = arith.addf %145, %148 : vector<16x1xf32>
      %150 = math.rsqrt %149 : vector<16x1xf32>
      %151 = vector.broadcast %150 : vector<16x1xf32> to vector<16x32xf32>
      %152 = arith.mulf %147, %151 : vector<16x32xf32>
      %153 = vector.broadcast %133 : vector<1x32xf32> to vector<16x32xf32>
      %154 = arith.mulf %152, %153 : vector<16x32xf32>
      %155 = vector.broadcast %134 : vector<1x32xf32> to vector<16x32xf32>
      %156 = arith.addf %154, %155 : vector<16x32xf32>
      %c0_70 = arith.constant 0 : index
      %c0_71 = arith.constant 0 : index
      %157 = vector.load %arg17[%c0_70, %c0_71] : memref<16x32xf32, #tpu.memory_space<vmem>>, vector<16x32xf32>
      tpu.vector_store %arg17[%c0_70, %c0_71], %156 {strides = array<i32>} : memref<16x32xf32, #tpu.memory_space<vmem>>, vector<16x32xf32>,
    } else {
    }
    return
  }
  func.func @transform_0(%arg0: i32, %arg1: i32) -> (i32, i32) {
    %c0_i32 = arith.constant 0 : i32
    %c0_i32_0 = arith.constant 0 : i32
    return %arg0, %c0_i32 : i32, i32
  }
  func.func @transform_1(%arg0: i32, %arg1: i32) -> (i32, i32, i32) {
    %c0_i32 = arith.constant 0 : i32
    %c0_i32_0 = arith.constant 0 : i32
    %c0_i32_1 = arith.constant 0 : i32
    return %arg1, %c0_i32, %c0_i32_0 : i32, i32, i32
  }
  func.func @transform_2(%arg0: i32, %arg1: i32) -> (i32, i32, i32) {
    %c0_i32 = arith.constant 0 : i32
    %c0_i32_0 = arith.constant 0 : i32
    %c0_i32_1 = arith.constant 0 : i32
    return %arg1, %c0_i32, %c0_i32_0 : i32, i32, i32
  }
  func.func @transform_3(%arg0: i32, %arg1: i32) -> (i32, i32, i32) {
    %c0_i32 = arith.constant 0 : i32
    %c0_i32_0 = arith.constant 0 : i32
    %c0_i32_1 = arith.constant 0 : i32
    return %arg1, %c0_i32, %c0_i32_0 : i32, i32, i32
  }
  func.func @transform_4(%arg0: i32, %arg1: i32) -> (i32, i32, i32) {
    %c0_i32 = arith.constant 0 : i32
    %c0_i32_0 = arith.constant 0 : i32
    %c0_i32_1 = arith.constant 0 : i32
    return %arg1, %c0_i32, %c0_i32_0 : i32, i32, i32
  }
  func.func @transform_5(%arg0: i32, %arg1: i32) -> (i32, i32, i32) {
    %c0_i32 = arith.constant 0 : i32
    %c0_i32_0 = arith.constant 0 : i32
    %c0_i32_1 = arith.constant 0 : i32
    return %arg1, %c0_i32, %c0_i32_0 : i32, i32, i32
  }
  func.func @transform_6(%arg0: i32, %arg1: i32) -> (i32, i32, i32) {
    %c0_i32 = arith.constant 0 : i32
    %c0_i32_0 = arith.constant 0 : i32
    %c0_i32_1 = arith.constant 0 : i32
    return %arg1, %c0_i32, %c0_i32_0 : i32, i32, i32
  }
  func.func @transform_7(%arg0: i32, %arg1: i32) -> (i32, i32, i32) {
    %c0_i32 = arith.constant 0 : i32
    %c0_i32_0 = arith.constant 0 : i32
    %c0_i32_1 = arith.constant 0 : i32
    return %arg1, %c0_i32, %c0_i32_0 : i32, i32, i32
  }
  func.func @transform_8(%arg0: i32, %arg1: i32) -> (i32, i32, i32) {
    %c0_i32 = arith.constant 0 : i32
    %c0_i32_0 = arith.constant 0 : i32
    %c0_i32_1 = arith.constant 0 : i32
    return %arg1, %c0_i32, %c0_i32_0 : i32, i32, i32
  }
  func.func @transform_9(%arg0: i32, %arg1: i32) -> (i32, i32, i32) {
    %c0_i32 = arith.constant 0 : i32
    %c0_i32_0 = arith.constant 0 : i32
    %c0_i32_1 = arith.constant 0 : i32
    return %arg1, %c0_i32, %c0_i32_0 : i32, i32, i32
  }
  func.func @transform_10(%arg0: i32, %arg1: i32) -> (i32, i32, i32) {
    %c0_i32 = arith.constant 0 : i32
    %c0_i32_0 = arith.constant 0 : i32
    %c0_i32_1 = arith.constant 0 : i32
    return %arg1, %c0_i32, %c0_i32_0 : i32, i32, i32
  }
  func.func @transform_11(%arg0: i32, %arg1: i32) -> (i32, i32, i32) {
    %c0_i32 = arith.constant 0 : i32
    %c0_i32_0 = arith.constant 0 : i32
    %c0_i32_1 = arith.constant 0 : i32
    return %arg1, %c0_i32, %c0_i32_0 : i32, i32, i32
  }
  func.func @transform_12(%arg0: i32, %arg1: i32) -> (i32, i32, i32) {
    %c0_i32 = arith.constant 0 : i32
    %c0_i32_0 = arith.constant 0 : i32
    %c0_i32_1 = arith.constant 0 : i32
    return %arg1, %c0_i32, %c0_i32_0 : i32, i32, i32
  }
  func.func @transform_13(%arg0: i32, %arg1: i32) -> (i32, i32) {
    %c0_i32 = arith.constant 0 : i32
    %c0_i32_0 = arith.constant 0 : i32
    %c0_i32_1 = arith.constant 0 : i32
    return %c0_i32, %c0_i32_0 : i32, i32
  }
  func.func @transform_14(%arg0: i32, %arg1: i32) -> (i32, i32) {
    %c0_i32 = arith.constant 0 : i32
    %c0_i32_0 = arith.constant 0 : i32
    %c0_i32_1 = arith.constant 0 : i32
    return %c0_i32, %c0_i32_0 : i32, i32
  }
  func.func @transform_15(%arg0: i32, %arg1: i32) -> (i32, i32) {
    %c0_i32 = arith.constant 0 : i32
    %c0_i32_0 = arith.constant 0 : i32
    return %arg0, %c0_i32 : i32, i32
  }
}

</mosaic_0001>

<bundles_post_ra>
// kernel: run.1
= control target key start
LH: loop header
LB: loop body
LE: loop exit
PB: predicated region body
PF: predicated region fallthrough
CT: control target
= control target key end

     0   :  { %s3819_s18 = smov 0   ;;  %s3821_s19 = smov 0   ;;  %s4399_s0 = inlined_call_operand.vmem [shape: f32[16,32], index: 0, kind: input, shape index: {}, may-alias: {0,15}]   ;;  %s4400_s1 = inlined_call_operand.vmem [shape: f32[2,1,32], index: 1, kind: input, shape index: {}]   ;;  %s4401_s2 = inlined_call_operand.vmem [shape: f32[2,1,32], index: 2, kind: input, shape index: {}]   ;;  %s4402_s3 = inlined_call_operand.vmem [shape: bf16[2,32,96], index: 3, kind: input, shape index: {}]   ;;  %s4403_s4 = inlined_call_operand.vmem [shape: f32[2,1,96], index: 4, kind: input, shape index: {}]   ;;  %s4404_s5 = inlined_call_operand.vmem [shape: bf16[2,32,32], index: 5, kind: input, shape index: {}]   ;;  %s4405_s6 = inlined_call_operand.vmem [shape: f32[2,1,32], index: 6, kind: input, shape index: {}]   ;;  %s4406_s7 = inlined_call_operand.vmem [shape: f32[2,1,32], index: 7, kind: input, shape index: {}]   ;;  %s4407_s8 = inlined_call_operand.vmem [shape: f32[2,1,32], index: 8, kind: input, shape index: {}]   ;;  %s4408_s9 = inlined_call_operand.vmem [shape: bf16[2,32,64], index: 9, kind: input, shape index: {}]   ;;  %s4409_s10 = inlined_call_operand.vmem [shape: f32[2,1,64], index: 10, kind: input, shape index: {}]   ;;  %s4410_s11 = inlined_call_operand.vmem [shape: bf16[2,64,32], index: 11, kind: input, shape index: {}]   ;;  %s4411_s12 = inlined_call_operand.vmem [shape: f32[2,1,32], index: 12, kind: input, shape index: {}]   ;;  %s4412_s13 = inlined_call_operand.vmem [shape: f32[1,32], index: 13, kind: input, shape index: {}]   ;;  %s4413_s14 = inlined_call_operand.vmem [shape: f32[1,32], index: 14, kind: input, shape index: {}]   ;;  %s4414_s15 = inlined_call_operand.vmem [shape: f32[16,32], index: 15, kind: output, shape index: {}, may-alias: {0,15}]  }
   0x1   :  { %4418 = sst [smem:[#allocation6_spill]] %s4401_s2  ;;  %s3823_s20 = smov 0  }
   0x2   :  { %4419 = sst [smem:[#allocation7_spill]] %s4402_s3 }
   0x3   :  { %4420 = sst [smem:[#allocation8_spill]] %s4404_s5 }
   0x4   :  { %4421 = sst [smem:[#allocation9_spill]] %s4412_s13 }
   0x5   :  { %4422 = sst [smem:[#allocation10_spill]] %s4413_s14 }
   0x6 LB: > { %4423 = sst [smem:[#allocation2_spill]] %s3720_s19  ;;  %s34_s21 = sadd.s32 1, %s3720_s19  ;;  %s3724_s20 = sphi %s3823_s20, %s25_s20   ;;  %s3720_s19 = sphi %s3821_s19, %s4440_s19   ;;  %s3716_s18 = sphi %s3819_s18, %s4439_s18  }
   0x7   : > { %4424 = sst [smem:[#allocation3_spill]] %s3724_s20  ;;  %p3336_p0 = scmp.ge.s32.totalorder %s3724_s20, 1 }
   0x8   : > { %p35_p1 = scmp.ge.s32.totalorder %s34_s21, 2  ;;  %p554_p2 = scmp.lt.s32.totalorder %s3724_s20, 3 }
   0xa   : > { %s4442_s21 = smov (%p35_p1, %s34_s21), 0  ;;  %p555_p3 = pnand %p3336_p0, %p554_p2 }
   0xb   : > { %4425 = sst [smem:[#allocation4_spill]] %s4442_s21 }
   0xc   : > { %558 = sbr.rel (%p555_p3) target bundleno = 2989 (0xbad), region = 80 }
  0x11   : > { %p652_p4 = scmp.lt.s32.totalorder %s3716_s18, 1  ;;  %s4427_s3 = sld [smem:[#allocation7_spill]] }
  0x12   : > { %s4428_s5 = sld [smem:[#allocation8_spill]]  ;;  %p3345_p5 = scmp.ne.s32.totalorder %s3716_s18, 0 }
  0x13   : > { %s3841_s22 = scalar_select %p652_p4, %s3716_s18, 1 }
  0x15   : > { %s3408_s29 = sshll.u32 %s3841_s22, 4  ;;  %s676_s2 = scalar_lea.vmem %s4406_s7, %s3841_s22 }
  0x16   : > { %s679_s17 = scalar_lea.vmem %s4407_s8, %s3841_s22  ;;  %s695_s30 = scalar_lea.vmem %s4411_s12, %s3841_s22 }
  0x17   : > { %s3859_s21 = scalar_lea.vmem %s4427_s3, %s3408_s29  ;;  %s3881_s3 = scalar_lea.vmem %s4408_s9, %s3408_s29 }
  0x18   : > { %s3864_s14 = scalar_lea.vmem %s4428_s5, %s3408_s29  ;;  %s687_s5 = scalar_lea.vmem %s4409_s10, %s3841_s22 }
  0x19   : > { %4429 = sst [smem:[#allocation5_spill]] %s3864_s14  ;;  %s3411_s14 = sshll.u32 %s3841_s22, 5 }
  0x1a   : > { %s3891_s26 = scalar_lea.vmem %s4410_s11, %s3411_s14  ;;  %706 = sbr.rel (%p3345_p5) target bundleno = 33 (0x21), region = 84 }
  0x1f   : > { %v707_v0 = vld [vmem:[%s4399_s0] sm:$0xff]  ;;  %vm709_vm0 = vcmask 261120   ;;  %v708_v1 = vld [vmem:[%s4399_s0 + $0x8] sm:$0xff] }
  0x20   : > { %710 = vst.msk [vmem:[%s4414_s15] sm:$0xff] %vm709_vm0, %v707_v0  ;;  %711 = vst.msk [vmem:[%s4414_s15 + $0x8] sm:$0xff] %vm709_vm0, %v708_v1 }
  0x21 PF: > { %vm716_vm1 = vcmask 261120   ;;  %v3642_v16 = vld [vmem:[%s3859_s21 + $0x8] sm:$0xff]   ;;  %v3726_v17 = vmov 0.0   ;;  %vm3727_vm2 = vmmov 0   ;;  %v3643_v18 = vld [vmem:[%s3859_s21] sm:$0xff]   ;;  %s4430_s23 = scalar_lea.vmem %s4400_s1, %s3841_s22  ;;  %s4431_s20 = sld [smem:[#allocation6_spill]]  ;;  %v862_v49 = vlaneseq }
  0x22   : > { %3458 = vmatprep.subr.bf16.mxu0 %v3726_v17  ;;  %3462 = vmatprep.mubr.msk.bf16.mxu0 %vm3727_vm2, %v3726_v17  ;;  %v3346_v27 = vld [vmem:[%s4430_s23] ss:$0 sm:$0xff]  ;;  %s4433_s28 = scalar_lea.vmem %s4403_s4, %s3841_s22  ;;  %s3728_s27 = smov 112   ;;  %v3732_v47 = vmov 1983009808   ;;  %vm1674_vm3 = vcmask 64512  }
  0x23   : > { %3459 = vmatpush3.bf16.msra.mxu0 %v3642_v16  ;;  %3466 = vmatprep.subr.bf16.mxu1 %v3726_v17  ;;  %v3348_v37 = vld [vmem:[%s4433_s28] ss:$0 sm:$0xff]  ;;  %s3729_s16 = smov 120   ;;  %s3730_s21 = smov 104   ;;  %v860_v48 = vunpack.c.l.s4 %v3732_v47  ;;  %v863_v52 = vshrl.u32 %v862_v49, 7  ;;  %vm2142_vm4 = vcmask 1043456  }
  0x24   : > { %3460 = vmatprep.subr.bf16.mxu0 %v3726_v17  ;;  %3468 = vmatprep.mubr.msk.bf16.mxu1 %vm3727_vm2, %v3726_v17  ;;  %s3731_s29 = smov 96   ;;  %v3733_v55 = vmov 1934713408   ;;  %s3735_s23 = smov 64   ;;  %vm2806_vm5 = vcmask 130048   ;;  %vm2809_vm6 = vcmask 195584  }
  0x25   : > { %v861_v51 = vunpack.c.0.s8 %v860_v48  ;;  %v891_v56 = vunpack.c.l.s4 %v3733_v55  ;;  %s4434_s24 = sld [smem:[#allocation5_spill]]  ;;  %s3736_s19 = smov 16   ;;  %vm3044_vm7 = vcmask 523264  }
  0x26   : > { %s4435_s28 = scalar_lea.vmem %s4405_s6, %s3841_s22  ;;  %p3400_p6 = scmp.ge.s32.totalorder %s3716_s18, 1 }
  0x27   : > { %v712_v2 = vld [vmem:[%s4414_s15] sm:$0xff]  ;;  %v713_v3 = vld [vmem:[%s4414_s15 + $0x8] sm:$0xff]  ;;  %3461 = vmatpush3.bf16.msra.mxu0 %v3643_v18  ;;  %s4432_s14 = scalar_lea.vmem %s4431_s20, %s3841_s22  ;;  %v3971_v60 = vsub.s32 %v861_v51, %v863_v52  ;;  %v892_v63 = vunpack.c.0.s8 %v891_v56  ;;  %s3737_s20 = smov 8  }
  0x28   : > { %v717_v4 = vsel %vm716_vm1, %v712_v2, 0.0  ;;  %v720_v5 = vsel %vm716_vm1, %v713_v3, 0.0  ;;  %3472 = vmatprep.subr.bf16.mxu0 %v3726_v17  ;;  %v3347_v31 = vld [vmem:[%s4432_s14] ss:$0 sm:$0xff]  ;;  %s3738_s14 = smov 24  }
  0x29   : > { %718 = vadd.xlane.f32.xlu0 %v717_v4  ;;  %v3734_v4 = vmov 0  }
  0x2d   : > { %721 = vadd.xlane.f32.xlu0 %v720_v5  ;;  %v3986_v5 = vpack.i.b16 %v3734_v4, %v3734_v4 }
  0xb2   : > { %v719_v6 = vpop.xlane.xlu0 %718 }
  0xb3   : > { %v724_v7 = vmul.f32 0.03125, %v719_v6 }
  0xb5   : > { %v726_v8 = vsub.f32 %v712_v2, %v724_v7 }
  0xb6   : > { %v722_v9 = vpop.xlane.xlu0 %721 }
  0xb7   : > { %v725_v10 = vmul.f32 0.03125, %v722_v9  ;;  %v728_v11 = vmul.f32 %v726_v8, %v726_v8 }
  0xb9   : > { %v727_v12 = vsub.f32 %v713_v3, %v725_v10  ;;  %v730_v13 = vsel %vm716_vm1, %v728_v11, 0.0 }
  0xba   : > { %731 = vadd.xlane.f32.xlu1 %v730_v13 }
  0xbb   : > { %v729_v14 = vmul.f32 %v727_v12, %v727_v12 }
  0xbd   : > { %v733_v15 = vsel %vm716_vm1, %v729_v14, 0.0 }
  0xbe   : > { %734 = vadd.xlane.f32.xlu1 %v733_v15 }
 0x143   : > { %v732_v19 = vpop.xlane.xlu1 %731 }
 0x144   : > { %v736_v20 = vmul.f32 0.03125, %v732_v19 }
 0x146   : > { %v738_v21 = vadd.f32 1e-06, %v736_v20 }
 0x147   : > { %v735_v22 = vpop.xlane.xlu1 %734 }
 0x148   : > { %3652 = vrsqrt.f32 %v738_v21  ;;  %v737_v23 = vmul.f32 0.03125, %v735_v22 }
 0x14a   : > { %v739_v24 = vadd.f32 1e-06, %v737_v23 }
 0x14c   : > { %3654 = vrsqrt.f32 %v739_v24 }
 0x155   : > { %v3653_v25 = vpop.eup %3652 }
 0x156   : > { %v742_v26 = vmul.f32 %v3653_v25, %v726_v8  ;;  %v3990_v8 = vsub.s32 %v892_v63, %v863_v52 }
 0x158   : > { %v750_v30 = vmul.f32 %v3346_v27, %v742_v26 }
 0x159   : > { %v3655_v28 = vpop.eup %3654 }
 0x15a   : > { %v743_v29 = vmul.f32 %v3655_v28, %v727_v12  ;;  %v758_v33 = vadd.f32 %v3347_v31, %v750_v30 }
 0x15c   : > { %v751_v32 = vmul.f32 %v3346_v27, %v743_v29 }
 0x15e   : > { %v759_v34 = vadd.f32 %v3347_v31, %v751_v32 }
 0x160   : > { %v760_v35 = vpack.c.bf16 %v759_v34, %v758_v33 }
 0x162   : > { %3463 = vmatmul.mubr.msk.bf16.vlgmr.msra.gmra.mxu0 %vm716_vm1, %v760_v35 }
 0x163   : > { %3474 = vmatprep.mubr.msk.bf16.mxu0 %vm3727_vm2, %v3726_v17 }
 0x222   : > { %v821_v36 = vpop.f32.mrf.mxu0 }
 0x223   : > { %v822_v40 = vadd.f32 %v3348_v37, %v821_v36 }
 0x224   : > { %v3464_v38 = vpop.f32.mrf.mxu0 }
 0x226   : > { %v824_v39 = vpop.f32.mrf.mxu0 }
 0x227   : > { %v825_v41 = vadd.f32 %v3348_v37, %v824_v39 }
 0x228   : > { %v3465_v42 = vpop.f32.mrf.mxu0 }
 0x229   : > { %v3948_v43 = vpack.c.bf16 %v825_v41, %v822_v40 }
 0x22b   : > { %832 = vrot.lane.b32.xlu1 %v3948_v43, %s3728_s27  ;;  %830 = vrot.lane.b32.xlu0 %v3948_v43, %s3729_s16  ;;  %v840_v58 = vshrl.u32 %v3948_v43, 16 }
 0x22f   : > { %834 = vrot.lane.b32.xlu1 %v3948_v43, %s3730_s21 }
 0x233   : > { %1114 = vrot.lane.b32.xlu1 %v3948_v43, %s3731_s29 }
 0x29d   : > { %v3954_v44 = vpop.permute.xlu1 %832  ;;  %v3956_v45 = vpop.permute.xlu0 %830 }
 0x29e   : > { %1118 = vrot.lane.b32.xlu1 %v3954_v44, %s3731_s29  ;;  %1116 = vrot.lane.b32.xlu0 %v3956_v45, %s3731_s29  ;;  %v848_v53 = vshrl.u32 %v3954_v44, 16  ;;  %v841_v54 = vshrl.u32 %v3956_v45, 16  ;;  %v3975_v61 = vpack.i.b16 %v3956_v45, %v3948_v43 }
 0x2a0   : > { %v3977_v62 = vpack.i.b16 %v841_v54, %v840_v58  ;;  %v865_v2 = vrot.slane %v3975_v61, %v3971_v60  ;;  %v858_v18 = vcombine.high %v3975_v61, %v3986_v5 }
 0x2a1   : > { %v3960_v46 = vpop.permute.xlu1 %834 }
 0x2a2   : > { %1120 = vrot.lane.b32.xlu0 %v3960_v46, %s3731_s29  ;;  %v849_v50 = vshrl.u32 %v3960_v46, 16  ;;  %v3968_v57 = vpack.i.b16 %v3960_v46, %v3954_v44  ;;  %v931_v6 = vrot.slane %v3977_v62, %v3971_v60  ;;  %v924_v22 = vcombine.high %v3977_v62, %v3986_v5 }
 0x2a4   : > { %v850_v59 = vpack.i.b16 %v849_v50, %v848_v53  ;;  %v880_v0 = vrot.slane %v3968_v57, %v3971_v60  ;;  %v873_v34 = vcombine.high %v3968_v57, %v3986_v5 }
 0x2a5   : > { %v1115_v3 = vpop.permute.xlu1 %1114 }
 0x2a6   : > { %v946_v1 = vrot.slane %v850_v59, %v3971_v60  ;;  %v888_v9 = vcombine.low %v865_v2, %v880_v0  ;;  %v889_v10 = vcombine.high %v865_v2, %v880_v0  ;;  %v1126_v14 = vshrl.u32 %v1115_v3, 16 }
 0x2a7   : > { %v939_v19 = vcombine.high %v850_v59, %v3986_v5 }
 0x2a8   : > { %v954_v12 = vcombine.low %v931_v6, %v946_v1  ;;  %v955_v13 = vcombine.high %v931_v6, %v946_v1  ;;  %v896_v23 = vrot.slane %v888_v9, %v3990_v8  ;;  %v903_v24 = vrot.slane %v889_v10, %v3990_v8 }
 0x2a9   : > { %v4008_v35 = vrot.slane %v939_v19, %v3971_v60 }
 0x2aa   : > { %v962_v26 = vrot.slane %v954_v12, %v3990_v8  ;;  %v969_v27 = vrot.slane %v955_v13, %v3990_v8  ;;  %v990_v38 = vcombine.low %v896_v23, %v903_v24  ;;  %v3352_v6 = vcombine.high %v896_v23, %v903_v24 }
 0x2ab   : > { %v887_v23 = vrot.slane %v873_v34, %v3971_v60 }
 0x2ac   : > { %v1015_v42 = vcombine.low %v962_v26, %v969_v27  ;;  %v3353_v50 = vcombine.high %v962_v26, %v969_v27  ;;  %v997_v26 = vrot.slane %v990_v38, %v3971_v60  ;;  %v1005_v27 = vrot.slane %v3352_v6, %v3971_v60 }
 0x2ae   : > { %v1022_v10 = vrot.slane %v1015_v42, %v3971_v60 }
 0x310   : > { %v1117_v7 = vpop.permute.xlu0 %1116  ;;  %v1119_v15 = vpop.permute.xlu1 %1118 }
 0x311   : > { %v1127_v11 = vshrl.u32 %v1117_v7, 16  ;;  %v1124_v16 = vpack.i.b16 %v1117_v7, %v1115_v3  ;;  %v1134_v28 = vshrl.u32 %v1119_v15, 16 }
 0x313   : > { %v1128_v20 = vpack.i.b16 %v1127_v11, %v1126_v14  ;;  %v1138_v30 = vcombine.high %v1124_v16, %v3986_v5  ;;  %v1145_v31 = vrot.slane %v1124_v16, %v3971_v60 }
 0x314   : > { %v1121_v21 = vpop.permute.xlu0 %1120 }
 0x315   : > { %v1132_v25 = vpack.i.b16 %v1121_v21, %v1119_v15  ;;  %v1135_v29 = vshrl.u32 %v1121_v21, 16  ;;  %v1204_v36 = vcombine.high %v1128_v20, %v3986_v5  ;;  %v1211_v47 = vrot.slane %v1128_v20, %v3971_v60 }
 0x316   : > { %v1152_v51 = vrot.slane %v1138_v30, %v3971_v60  ;;  %v1030_v20 = vrot.slane %v3353_v50, %v3971_v60  ;;  %v938_v21 = vrot.slane %v924_v22, %v3971_v60  ;;  %v872_v30 = vrot.slane %v858_v18, %v3971_v60 }
 0x317   : > { %v1153_v32 = vcombine.high %v1132_v25, %v3986_v5  ;;  %v1160_v33 = vrot.slane %v1132_v25, %v3971_v60  ;;  %v1136_v37 = vpack.i.b16 %v1135_v29, %v1134_v28  ;;  %v1218_v54 = vrot.slane %v1204_v36, %v3971_v60 }
 0x318   : > { %v1031_v36 = vcombine.low %v1022_v10, %v1030_v20  ;;  %v905_v38 = vcombine.high %v872_v30, %v887_v23 }
 0x319   : > { %v1167_v39 = vrot.slane %v1153_v32, %v3971_v60  ;;  %v1168_v40 = vcombine.low %v1145_v31, %v1160_v33  ;;  %v1169_v41 = vcombine.high %v1145_v31, %v1160_v33  ;;  %v1219_v48 = vcombine.high %v1136_v37, %v3986_v5 }
 0x31a   : > { %v1226_v49 = vrot.slane %v1136_v37, %v3971_v60  ;;  %v970_v32 = vcombine.low %v938_v21, %v4008_v35  ;;  %v971_v33 = vcombine.high %v938_v21, %v4008_v35  ;;  %v904_v37 = vcombine.low %v872_v30, %v887_v23 }
 0x31b   : > { %v1176_v52 = vrot.slane %v1168_v40, %v3990_v8  ;;  %v1183_v53 = vrot.slane %v1169_v41, %v3990_v8  ;;  %v1233_v55 = vrot.slane %v1219_v48, %v3971_v60  ;;  %v1184_v58 = vcombine.low %v1152_v51, %v1167_v39 }
 0x31c   : > { %v1234_v56 = vcombine.low %v1211_v47, %v1226_v49  ;;  %v1235_v57 = vcombine.high %v1211_v47, %v1226_v49  ;;  %v1185_v59 = vcombine.high %v1152_v51, %v1167_v39  ;;  %v1006_v41 = vcombine.low %v997_v26, %v1005_v27 }
 0x31d   : > { %v1270_v62 = vcombine.low %v1176_v52, %v1183_v53  ;;  %v3356_v63 = vcombine.high %v1176_v52, %v1183_v53  ;;  %v1250_v2 = vcombine.low %v1218_v54, %v1233_v55  ;;  %v1251_v3 = vcombine.high %v1218_v54, %v1233_v55 }
 0x31e   : > { %v1242_v0 = vrot.slane %v1234_v56, %v3990_v8  ;;  %v1249_v1 = vrot.slane %v1235_v57, %v3990_v8  ;;  %v1192_v15 = vrot.slane %v1184_v58, %v3990_v8  ;;  %v1199_v16 = vrot.slane %v1185_v59, %v3990_v8 }
 0x31f   : > { %v1277_v7 = vrot.slane %v1270_v62, %v3971_v60  ;;  %v1285_v9 = vrot.slane %v3356_v63, %v3971_v60  ;;  %v1258_v11 = vrot.slane %v1250_v2, %v3990_v8  ;;  %v1265_v12 = vrot.slane %v1251_v3, %v3990_v8 }
 0x320   : > { %v1295_v13 = vcombine.low %v1242_v0, %v1249_v1  ;;  %v3357_v14 = vcombine.high %v1242_v0, %v1249_v1  ;;  %v1320_v34 = vcombine.low %v1192_v15, %v1199_v16  ;;  %v3358_v39 = vcombine.high %v1192_v15, %v1199_v16 }
 0x321   : > { %v1286_v19 = vcombine.low %v1277_v7, %v1285_v9  ;;  %v1345_v28 = vcombine.low %v1258_v11, %v1265_v12  ;;  %v3359_v29 = vcombine.high %v1258_v11, %v1265_v12  ;;  %v978_v35 = vrot.slane %v970_v32, %v3990_v8 }
 0x322   : > { %v1302_v24 = vrot.slane %v1295_v13, %v3971_v60  ;;  %v1310_v25 = vrot.slane %v3357_v14, %v3971_v60  ;;  %v985_v50 = vrot.slane %v971_v33, %v3990_v8  ;;  %v1327_v51 = vrot.slane %v1320_v34, %v3971_v60 }
 0x323   : > { %v1293_v31 = vrot.slane %v1286_v19, %v3990_v8  ;;  %v1352_v42 = vrot.slane %v1345_v28, %v3971_v60  ;;  %v1360_v61 = vrot.slane %v3359_v29, %v3971_v60  ;;  %v1038_v52 = vrot.slane %v1031_v36, %v3990_v8 }
 0x324   : > { %v1311_v22 = vcombine.low %v1302_v24, %v1310_v25  ;;  %v1335_v53 = vrot.slane %v3358_v39, %v3971_v60  ;;  %v912_v57 = vrot.slane %v904_v37, %v3990_v8  ;;  %v919_v58 = vrot.slane %v905_v38, %v3990_v8 }
 0x325   : > { %v1373_v47 = vshrl.u32 %v1293_v31, 16  ;;  %v1294_v56 = vcombine.high %v1293_v31, %v3734_v4  ;;  %v1013_v62 = vrot.slane %v1006_v41, %v3990_v8  ;;  %v1361_v0 = vcombine.low %v1352_v42, %v1360_v61 }
 0x326   : > { %v1318_v40 = vrot.slane %v1311_v22, %v3990_v8  ;;  %v1065_v1 = vcombine.low %v978_v35, %v985_v50  ;;  %v3355_v2 = vcombine.high %v978_v35, %v985_v50  ;;  %v1094_v6 = vshrl.u32 %v1038_v52, 16 }
 0x327   : > { %v1379_v7 = vshrl.u32 %v1294_v56, 16  ;;  %v1336_v9 = vcombine.low %v1327_v51, %v1335_v53  ;;  %v1040_v10 = vcombine.low %v912_v57, %v919_v58  ;;  %v3354_v11 = vcombine.high %v912_v57, %v919_v58 }
 0x328   : > { %v1372_v18 = vpack.i.b16 %v1318_v40, %v1293_v31  ;;  %v1374_v48 = vshrl.u32 %v1318_v40, 16  ;;  %v1319_v49 = vcombine.high %v1318_v40, %v3734_v4  ;;  %v1092_v12 = vpack.i.b16 %v1038_v52, %v1013_v62 }
 0x329   : > { %v1093_v13 = vshrl.u32 %v1013_v62, 16  ;;  %v1368_v15 = vrot.slane %v1361_v0, %v3990_v8  ;;  %v1072_v16 = vrot.slane %v1065_v1, %v3971_v60  ;;  %v1080_v19 = vrot.slane %v3355_v2, %v3971_v60 }
 0x32a   : > { %v1679_v54 = vsel %vm1674_vm3, %v1372_v18, 0  ;;  %v1375_v55 = vpack.i.b16 %v1374_v48, %v1373_v47  ;;  %v1380_v63 = vshrl.u32 %v1319_v49, 16  ;;  %v1378_v3 = vpack.i.b16 %v1319_v49, %v1294_v56 }
 0x32b   : > { %3467 = vmatpush3.bf16.xpose.msra.mxu1 %v1679_v54  ;;  %v1095_v21 = vpack.i.b16 %v1094_v6, %v1093_v13  ;;  %v1039_v23 = vcombine.high %v1038_v52, %v3734_v4  ;;  %v1343_v24 = vrot.slane %v1336_v9, %v3990_v8  ;;  %v1047_v25 = vrot.slane %v1040_v10, %v3971_v60 }
 0x32c   : > { %v1725_v59 = vsel %vm1674_vm3, %v1375_v55, 0  ;;  %3478 = vmatprep.subr.bf16.mxu1 %v3726_v17  ;;  %v1381_v14 = vpack.i.b16 %v1380_v63, %v1379_v7  ;;  %v1771_v20 = vsel %vm1674_vm3, %v1378_v3, 0  ;;  %v1055_v26 = vrot.slane %v3354_v11, %v3971_v60 }
 0x32d   : > { %3473 = vmatpush3.bf16.xpose.msra.mxu0 %v1725_v59  ;;  %v1014_v28 = vcombine.high %v1013_v62, %v3734_v4  ;;  %v1386_v29 = vshrl.u32 %v1368_v15, 16  ;;  %v1384_v30 = vpack.i.b16 %v1368_v15, %v1343_v24  ;;  %v1100_v31 = vshrl.u32 %v1039_v23, 16 }
 0x32e   : > { %3484 = vmatprep.subr.bf16.mxu0 %v3726_v17  ;;  %v1817_v27 = vsel %vm1674_vm3, %v1381_v14, 0  ;;  %v1385_v22 = vshrl.u32 %v1343_v24, 16  ;;  %v1081_v32 = vcombine.low %v1072_v16, %v1080_v19  ;;  %v1056_v33 = vcombine.low %v1047_v25, %v1055_v26 }
 0x32f   : > { %v1098_v34 = vpack.i.b16 %v1039_v23, %v1014_v28  ;;  %v1099_v36 = vshrl.u32 %v1014_v28, 16  ;;  %v1369_v38 = vcombine.high %v1368_v15, %v3734_v4  ;;  %v1863_v39 = vsel %vm1674_vm3, %v1384_v30, 0 }
 0x330   : > { %v1387_v37 = vpack.i.b16 %v1386_v29, %v1385_v22  ;;  %v1088_v41 = vrot.slane %v1081_v32, %v3990_v8  ;;  %v1344_v42 = vcombine.high %v1343_v24, %v3734_v4  ;;  %v1063_v18 = vrot.slane %v1056_v33, %v3990_v8 }
 0x331   : > { %v1101_v40 = vpack.i.b16 %v1100_v31, %v1099_v36  ;;  %v1392_v47 = vshrl.u32 %v1369_v38, 16 }
 0x332   : > { %3469 = vmatmul.mubr.msk.bf16.vlgmr.msra.gmra.mxu1 %vm1674_vm3, %v1092_v12  ;;  %v1909_v61 = vsel %vm1674_vm3, %v1387_v37, 0  ;;  %v1390_v48 = vpack.i.b16 %v1369_v38, %v1344_v42  ;;  %v1106_v49 = vshrl.u32 %v1088_v41, 16  ;;  %v1391_v35 = vshrl.u32 %v1344_v42, 16 }
 0x333   : > { %3479 = vmatpush3.bf16.xpose.msra.mxu1 %v1771_v20  ;;  %3480 = vmatprep.mubr.msk.bf16.mxu1 %vm3727_vm2, %v3726_v17  ;;  %v1104_v50 = vpack.i.b16 %v1088_v41, %v1063_v18  ;;  %v1105_v51 = vshrl.u32 %v1063_v18, 16  ;;  %v1089_v55 = vcombine.high %v1088_v41, %v3734_v4  ;;  %v1064_v57 = vcombine.high %v1063_v18, %v3734_v4 }
 0x334   : > { %3475 = vmatmul.mubr.msk.bf16.vlgmr.msra.gmra.mxu0 %vm1674_vm3, %v1095_v21  ;;  %3490 = vmatprep.subr.bf16.mxu1 %v3726_v17  ;;  %v1393_v52 = vpack.i.b16 %v1392_v47, %v1391_v35  ;;  %v1955_v53 = vsel %vm1674_vm3, %v1390_v48, 0 }
 0x335   : > { %3485 = vmatpush3.bf16.xpose.msra.mxu0 %v1817_v27  ;;  %3486 = vmatprep.mubr.msk.bf16.mxu0 %vm3727_vm2, %v3726_v17  ;;  %v1107_v54 = vpack.i.b16 %v1106_v49, %v1105_v51  ;;  %v1112_v58 = vshrl.u32 %v1089_v55, 16  ;;  %v1110_v59 = vpack.i.b16 %v1089_v55, %v1064_v57  ;;  %v1111_v62 = vshrl.u32 %v1064_v57, 16 }
 0x336   : > { %3496 = vmatprep.subr.bf16.mxu0 %v3726_v17  ;;  %v2001_v56 = vsel %vm1674_vm3, %v1393_v52, 0 }
 0x337   : > { %v1113_v63 = vpack.i.b16 %v1112_v58, %v1111_v62 }
 0x33a   : > { %3481 = vmatmul.mubr.msk.bf16.vlgmr.msra.gmra.mxu1 %vm1674_vm3, %v1098_v34 }
 0x33b   : > { %3491 = vmatpush3.bf16.xpose.msra.mxu1 %v1863_v39  ;;  %3492 = vmatprep.mubr.msk.bf16.mxu1 %vm3727_vm2, %v3726_v17 }
 0x33c   : > { %3487 = vmatmul.mubr.msk.bf16.vlgmr.msra.gmra.mxu0 %vm1674_vm3, %v1101_v40  ;;  %3502 = vmatprep.subr.bf16.mxu1 %v3726_v17 }
 0x33d   : > { %3497 = vmatpush3.bf16.xpose.msra.mxu0 %v1909_v61  ;;  %3498 = vmatprep.mubr.msk.bf16.mxu0 %vm3727_vm2, %v3726_v17 }
 0x33e   : > { %3508 = vmatprep.subr.bf16.mxu0 %v3726_v17 }
 0x342   : > { %3493 = vmatmul.mubr.msk.bf16.vlgmr.msra.gmra.mxu1 %vm1674_vm3, %v1104_v50 }
 0x343   : > { %3503 = vmatpush3.bf16.xpose.msra.mxu1 %v1955_v53  ;;  %3504 = vmatprep.mubr.msk.bf16.mxu1 %vm3727_vm2, %v3726_v17 }
 0x344   : > { %3499 = vmatmul.mubr.msk.bf16.vlgmr.msra.gmra.mxu0 %vm1674_vm3, %v1107_v54  ;;  %3514 = vmatprep.subr.bf16.mxu1 %v3726_v17 }
 0x345   : > { %3509 = vmatpush3.bf16.xpose.msra.mxu0 %v2001_v56  ;;  %3510 = vmatprep.mubr.msk.bf16.mxu0 %vm3727_vm2, %v3726_v17 }
 0x346   : > { %3520 = vmatprep.subr.bf16.mxu0 %v3726_v17 }
 0x34a   : > { %3505 = vmatmul.mubr.msk.bf16.vlgmr.msra.gmra.mxu1 %vm1674_vm3, %v1110_v59 }
 0x34b   : > { %3516 = vmatprep.mubr.msk.bf16.mxu1 %vm3727_vm2, %v3726_v17 }
 0x34c   : > { %3511 = vmatmul.mubr.msk.bf16.vlgmr.msra.gmra.mxu0 %vm1674_vm3, %v1113_v63 }
 0x34d   : > { %3522 = vmatprep.mubr.msk.bf16.mxu0 %vm3727_vm2, %v3726_v17 }
 0x3f2   : > { %v1715_v0 = vpop.f32.mrf.mxu1 }
 0x3f3   : > { %v2043_v1 = vsel %vm1674_vm3, %v1715_v0, -inf }
 0x3f4   : > { %2044 = vmax.xlane.f32.xlu1 %v2043_v1  ;;  %v3470_v2 = vpop.f32.mrf.mxu1  ;;  %v1761_v3 = vpop.f32.mrf.mxu0 }
 0x3f5   : > { %v2046_v6 = vsel %vm1674_vm3, %v1761_v3, -inf }
 0x3f6   : > { %v1718_v7 = vpop.f32.mrf.mxu1  ;;  %2047 = vmax.xlane.f32.xlu0 %v2046_v6  ;;  %v3476_v9 = vpop.f32.mrf.mxu0 }
 0x3f8   : > { %v3471_v10 = vpop.f32.mrf.mxu1  ;;  %v1764_v11 = vpop.f32.mrf.mxu0 }
 0x3fa   : > { %v3477_v12 = vpop.f32.mrf.mxu0  ;;  %v4112_v13 = vpop.f32.mrf.mxu1 }
 0x3fb   : > { %v2049_v14 = vsel %vm1674_vm3, %v4112_v13, -inf }
 0x3fc   : > { %v3482_v15 = vpop.f32.mrf.mxu1  ;;  %2050 = vmax.xlane.f32.xlu0 %v2049_v14  ;;  %v1853_v16 = vpop.f32.mrf.mxu0 }
 0x3fd   : > { %v2052_v21 = vsel %vm1674_vm3, %v1853_v16, -inf }
 0x3fe   : > { %v1810_v19 = vpop.f32.mrf.mxu1  ;;  %v3488_v20 = vpop.f32.mrf.mxu0 }
 0x400   : > { %v3483_v23 = vpop.f32.mrf.mxu1  ;;  %2053 = vmax.xlane.f32.xlu0 %v2052_v21  ;;  %v1856_v24 = vpop.f32.mrf.mxu0 }
 0x402   : > { %v3489_v25 = vpop.f32.mrf.mxu0  ;;  %v1899_v26 = vpop.f32.mrf.mxu1 }
 0x403   : > { %v2055_v27 = vsel %vm1674_vm3, %v1899_v26, -inf }
 0x404   : > { %2056 = vmax.xlane.f32.xlu1 %v2055_v27  ;;  %v3494_v28 = vpop.f32.mrf.mxu1  ;;  %v1945_v29 = vpop.f32.mrf.mxu0 }
 0x405   : > { %v2058_v30 = vsel %vm1674_vm3, %v1945_v29, -inf }
 0x406   : > { %v1902_v31 = vpop.f32.mrf.mxu1  ;;  %2059 = vmax.xlane.f32.xlu0 %v2058_v30  ;;  %v3500_v22 = vpop.f32.mrf.mxu0 }
 0x408   : > { %v3495_v32 = vpop.f32.mrf.mxu1  ;;  %v1948_v33 = vpop.f32.mrf.mxu0 }
 0x40a   : > { %v3501_v34 = vpop.f32.mrf.mxu0  ;;  %v1991_v36 = vpop.f32.mrf.mxu1 }
 0x40b   : > { %v2061_v37 = vsel %vm1674_vm3, %v1991_v36, -inf }
 0x40c   : > { %2062 = vmax.xlane.f32.xlu1 %v2061_v37  ;;  %v3506_v38 = vpop.f32.mrf.mxu1  ;;  %v2037_v39 = vpop.f32.mrf.mxu0 }
 0x40d   : > { %v2064_v40 = vsel %vm1674_vm3, %v2037_v39, -inf }
 0x40e   : > { %v1994_v41 = vpop.f32.mrf.mxu1  ;;  %2065 = vmax.xlane.f32.xlu0 %v2064_v40  ;;  %v3512_v42 = vpop.f32.mrf.mxu0 }
 0x410   : > { %v3507_v61 = vpop.f32.mrf.mxu1  ;;  %v2040_v18 = vpop.f32.mrf.mxu0 }
 0x412   : > { %v3513_v47 = vpop.f32.mrf.mxu0 }
 0x41d   : > { %1394 = vrot.lane.b32.xlu1 %v3948_v43, %s3735_s23 }
 0x47d   : > { %v2045_v48 = vpop.xlane.xlu1 %2044 }
 0x47e   : > { %v2067_v49 = vsub.f32 %v1715_v0, %v2045_v48 }
 0x47f   : > { %v2048_v35 = vpop.xlane.xlu0 %2047 }
 0x480   : > { %v2075_v50 = vmul.f32 1.442695, %v2067_v49  ;;  %v2068_v51 = vsub.f32 %v1761_v3, %v2048_v35 }
 0x482   : > { %3656 = vpow2.f32 %v2075_v50  ;;  %v2077_v52 = vmul.f32 1.442695, %v2068_v51 }
 0x484   : > { %3658 = vpow2.f32 %v2077_v52 }
 0x485   : > { %v2051_v43 = vpop.xlane.xlu0 %2050 }
 0x486   : > { %v2069_v62 = vsub.f32 %v4112_v13, %v2051_v43 }
 0x488   : > { %v2079_v3 = vmul.f32 1.442695, %v2069_v62 }
 0x489   : > { %v2054_v57 = vpop.xlane.xlu0 %2053 }
 0x48a   : > { %v2070_v59 = vsub.f32 %v1853_v16, %v2054_v57 }
 0x48c   : > { %v2081_v0 = vmul.f32 1.442695, %v2070_v59 }
 0x48d   : > { %v2057_v58 = vpop.xlane.xlu1 %2056 }
 0x48e   : > { %v2071_v1 = vsub.f32 %v1899_v26, %v2057_v58  ;;  %3660 = vpow2.f32 %v2081_v0 }
 0x48f   : > { %v4122_v53 = vpop.eup %3656  ;;  %v2060_v2 = vpop.xlane.xlu0 %2059  ;;  %3662 = vpow2.f32 %v2079_v3 }
 0x490   : > { %v2091_v54 = vsel %vm1674_vm3, %v4122_v53, 0.0  ;;  %v2083_v7 = vmul.f32 1.442695, %v2071_v1  ;;  %v2072_v9 = vsub.f32 %v1945_v29, %v2060_v2 }
 0x491   : > { %v4126_v55 = vpop.eup %3658  ;;  %2092 = vadd.xlane.f32.xlu1 %v2091_v54 }
 0x492   : > { %v2094_v56 = vsel %vm1674_vm3, %v4126_v55, 0.0  ;;  %3664 = vpow2.f32 %v2083_v7 }
 0x493   : > { %2095 = vadd.xlane.f32.xlu0 %v2094_v56 }
 0x495   : > { %v2063_v63 = vpop.xlane.xlu1 %2062 }
 0x496   : > { %v2073_v6 = vsub.f32 %v1991_v36, %v2063_v63 }
 0x498   : > { %v2087_v10 = vmul.f32 1.442695, %v2073_v6 }
 0x499   : > { %v1395_v27 = vpop.permute.xlu1 %1394 }
 0x49a   : > { %3666 = vpow2.f32 %v2087_v10  ;;  %v1406_v32 = vshrl.u32 %v1395_v27, 16 }
 0x49b   : > { %v4134_v12 = vpop.eup %3660 }
 0x49c   : > { %v4136_v13 = vpop.eup %3662  ;;  %v2100_v14 = vsel %vm1674_vm3, %v4134_v12, 0.0 }
 0x49d   : > { %v2097_v16 = vsel %vm1674_vm3, %v4136_v13, 0.0 }
 0x49f   : > { %v4140_v15 = vpop.eup %3664 }
 0x4a0   : > { %v2103_v20 = vsel %vm1674_vm3, %v4140_v15, 0.0 }
 0x4a2   : > { %1398 = vrot.lane.b32.xlu1 %v3954_v44, %s3735_s23  ;;  %v2066_v44 = vpop.xlane.xlu0 %2065 }
 0x4a6   : > { %1400 = vrot.lane.b32.xlu1 %v3960_v46, %s3735_s23  ;;  %v2085_v46 = vmul.f32 1.442695, %v2072_v9 }
 0x4a7   : > { %v4144_v19 = vpop.eup %3666 }
 0x4a8   : > { %3668 = vpow2.f32 %v2085_v46  ;;  %v2109_v23 = vsel %vm1674_vm3, %v4144_v19, 0.0 }
 0x4a9   : > { %1396 = vrot.lane.b32.xlu0 %v3956_v45, %s3735_s23  ;;  %v2074_v45 = vsub.f32 %v2037_v39, %v2066_v44 }
 0x4ab   : > { %v2089_v11 = vmul.f32 1.442695, %v2074_v45 }
 0x4ad   : > { %3670 = vpow2.f32 %v2089_v11 }
 0x4b5   : > { %v4148_v21 = vpop.eup %3668 }
 0x4b6   : > { %v2106_v24 = vsel %vm1674_vm3, %v4148_v21, 0.0 }
 0x4ba   : > { %v4154_v25 = vpop.eup %3670 }
 0x4bb   : > { %v2112_v26 = vsel %vm1674_vm3, %v4154_v25, 0.0 }
 0x4c8   : > { %2101 = vadd.xlane.f32.xlu0 %v2100_v14 }
 0x4ca   : > { %2098 = vadd.xlane.f32.xlu1 %v2097_v16 }
 0x4cc   : > { %2104 = vadd.xlane.f32.xlu0 %v2103_v20 }
 0x4ce   : > { %2110 = vadd.xlane.f32.xlu1 %v2109_v23 }
 0x4d0   : > { %2107 = vadd.xlane.f32.xlu0 %v2106_v24 }
 0x4d4   : > { %2113 = vadd.xlane.f32.xlu0 %v2112_v26 }
 0x51a   : > { %v2093_v28 = vpop.xlane.xlu1 %2092 }
 0x51b   : > { %3672 = vrcp.f32 %v2093_v28 }
 0x51c   : > { %v2096_v29 = vpop.xlane.xlu0 %2095 }
 0x51d   : > { %3674 = vrcp.f32 %v2096_v29 }
 0x51e   : > { %v1399_v30 = vpop.permute.xlu1 %1398 }
 0x51f   : > { %v1414_v37 = vshrl.u32 %v1399_v30, 16 }
 0x520   : > { %v1397_v31 = vpop.permute.xlu0 %1396 }
 0x521   : > { %v1407_v22 = vshrl.u32 %v1397_v31, 16  ;;  %v4158_v33 = vpack.i.b16 %v1397_v31, %v1395_v27 }
 0x522   : > { %v1401_v34 = vpop.permute.xlu1 %1400 }
 0x523   : > { %v4160_v36 = vpack.i.b16 %v1401_v34, %v1399_v30  ;;  %v4162_v38 = vpack.i.b16 %v1407_v22, %v1406_v32  ;;  %v1415_v39 = vshrl.u32 %v1401_v34, 16  ;;  %v1425_v40 = vrot.slane %v4158_v33, %v3971_v60 }
 0x525   : > { %v1416_v41 = vpack.i.b16 %v1415_v39, %v1414_v37  ;;  %v1440_v42 = vrot.slane %v4160_v36, %v3971_v60  ;;  %v1491_v61 = vrot.slane %v4162_v38, %v3971_v60  ;;  %v1484_v22 = vcombine.high %v4162_v38, %v3986_v5 }
 0x526   : > { %v1433_v32 = vcombine.high %v4160_v36, %v3986_v5  ;;  %v1418_v37 = vcombine.high %v4158_v33, %v3986_v5 }
 0x527   : > { %v1448_v18 = vcombine.low %v1425_v40, %v1440_v42  ;;  %v1449_v47 = vcombine.high %v1425_v40, %v1440_v42  ;;  %v1506_v48 = vrot.slane %v1416_v41, %v3971_v60  ;;  %v1499_v30 = vcombine.high %v1416_v41, %v3986_v5 }
 0x528   : > { %v3673_v2 = vpop.eup %3672  ;;  %v1498_v36 = vrot.slane %v1484_v22, %v3971_v60  ;;  %v1447_v38 = vrot.slane %v1433_v32, %v3971_v60  ;;  %v1432_v40 = vrot.slane %v1418_v37, %v3971_v60 }
 0x529   : > { %v1456_v49 = vrot.slane %v1448_v18, %v3990_v8  ;;  %v1463_v35 = vrot.slane %v1449_v47, %v3990_v8  ;;  %v1514_v50 = vcombine.low %v1491_v61, %v1506_v48  ;;  %v1515_v51 = vcombine.high %v1491_v61, %v1506_v48 }
 0x52a   : > { %v3675_v7 = vpop.eup %3674  ;;  %v2123_v10 = vmul.f32 %v3673_v2, %v4122_v53  ;;  %v1513_v39 = vrot.slane %v1499_v30, %v3971_v60  ;;  %v1464_v61 = vcombine.low %v1432_v40, %v1447_v38  ;;  %v1465_v18 = vcombine.high %v1432_v40, %v1447_v38 }
 0x52b   : > { %v1522_v52 = vrot.slane %v1514_v50, %v3990_v8  ;;  %v1550_v54 = vcombine.low %v1456_v49, %v1463_v35  ;;  %v1529_v56 = vrot.slane %v1515_v51, %v3990_v8  ;;  %v3360_v43 = vcombine.high %v1456_v49, %v1463_v35 }
 0x52c   : > { %v2124_v16 = vmul.f32 %v3675_v7, %v4126_v55  ;;  %v2131_v29 = vpack.c.bf16 %v2123_v10, %v2123_v10  ;;  %v1530_v41 = vcombine.low %v1498_v36, %v1513_v39  ;;  %v1531_v42 = vcombine.high %v1498_v36, %v1513_v39 }
 0x52d   : > { %v1557_v57 = vrot.slane %v1550_v54, %v3971_v60  ;;  %v1565_v58 = vrot.slane %v3360_v43, %v3971_v60  ;;  %v1575_v59 = vcombine.low %v1522_v52, %v1529_v56  ;;  %v3361_v62 = vcombine.high %v1522_v52, %v1529_v56 }
 0x52e   : > { %v2132_v31 = vpack.c.bf16 %v2124_v16, %v2124_v16  ;;  %v1538_v5 = vrot.slane %v1530_v41, %v3990_v8  ;;  %v1545_v33 = vrot.slane %v1531_v42, %v3990_v8  ;;  %v1472_v47 = vrot.slane %v1464_v61, %v3990_v8 }
 0x52f   : > { %v1582_v63 = vrot.slane %v1575_v59, %v3971_v60  ;;  %v1590_v0 = vrot.slane %v3361_v62, %v3971_v60  ;;  %v1566_v1 = vcombine.low %v1557_v57, %v1565_v58  ;;  %v1479_v48 = vrot.slane %v1465_v18, %v3990_v8 }
 0x530   : > { %v1625_v49 = vcombine.low %v1538_v5, %v1545_v33  ;;  %v3363_v35 = vcombine.high %v1538_v5, %v1545_v33 }
 0x531   : > { %v1573_v3 = vrot.slane %v1566_v1, %v3990_v8  ;;  %v1591_v6 = vcombine.low %v1582_v63, %v1590_v0  ;;  %v1600_v50 = vcombine.low %v1472_v47, %v1479_v48  ;;  %v3362_v51 = vcombine.high %v1472_v47, %v1479_v48 }
 0x532   : > { %v1632_v52 = vrot.slane %v1625_v49, %v3971_v60  ;;  %v1640_v54 = vrot.slane %v3363_v35, %v3971_v60 }
 0x533   : > { %v1598_v9 = vrot.slane %v1591_v6, %v3990_v8  ;;  %v1574_v44 = vcombine.high %v1573_v3, %v3734_v4  ;;  %v1653_v45 = vshrl.u32 %v1573_v3, 16  ;;  %v1607_v43 = vrot.slane %v1600_v50, %v3971_v60 }
 0x534   : > { %v1615_v57 = vrot.slane %v3362_v51, %v3971_v60  ;;  %v1641_v59 = vcombine.low %v1632_v52, %v1640_v54 }
 0x535   : > { %v1652_v46 = vpack.i.b16 %v1598_v9, %v1573_v3  ;;  %v1654_v11 = vshrl.u32 %v1598_v9, 16  ;;  %v1599_v14 = vcombine.high %v1598_v9, %v3734_v4  ;;  %v1659_v20 = vshrl.u32 %v1574_v44, 16 }
 0x536   : > { %v1616_v63 = vcombine.low %v1607_v43, %v1615_v57  ;;  %v1648_v0 = vrot.slane %v1641_v59, %v3990_v8 }
 0x537   : > { %v2144_v23 = vsel %vm2142_vm4, %v1652_v46, 0  ;;  %v1655_v24 = vpack.i.b16 %v1654_v11, %v1653_v45  ;;  %v1658_v26 = vpack.i.b16 %v1599_v14, %v1574_v44  ;;  %v1660_v27 = vshrl.u32 %v1599_v14, 16 }
 0x538   : > { %3515 = vmatpush3.bf16.msra.mxu1 %v2144_v23  ;;  %v1623_v2 = vrot.slane %v1616_v63, %v3990_v8  ;;  %v1666_v3 = vshrl.u32 %v1648_v0, 16  ;;  %v1649_v45 = vcombine.high %v1648_v0, %v3734_v4 }
 0x539   : > { %v2190_v28 = vsel %vm2142_vm4, %v1655_v24, 0  ;;  %3526 = vmatprep.subr.bf16.mxu1 %v3726_v17  ;;  %v1661_v53 = vpack.i.b16 %v1660_v27, %v1659_v20  ;;  %v2236_v55 = vsel %vm2142_vm4, %v1658_v26, 0 }
 0x53a   : > { %3521 = vmatpush3.bf16.msra.mxu0 %v2190_v28  ;;  %v1665_v9 = vshrl.u32 %v1623_v2, 16  ;;  %v1664_v20 = vpack.i.b16 %v1648_v0, %v1623_v2  ;;  %v1624_v23 = vcombine.high %v1623_v2, %v3734_v4  ;;  %v1672_v27 = vshrl.u32 %v1649_v45, 16 }
 0x53b   : > { %3517 = vmatmul.mubr.msk.bf16.vlgmr.msra.gmra.mxu1 %vm1674_vm3, %v2131_v29  ;;  %3532 = vmatprep.subr.bf16.mxu0 %v3726_v17  ;;  %v2282_v34 = vsel %vm2142_vm4, %v1661_v53, 0 }
 0x53c   : > { %3527 = vmatpush3.bf16.msra.mxu1 %v2236_v55  ;;  %3528 = vmatprep.mubr.msk.bf16.mxu1 %vm3727_vm2, %v3726_v17  ;;  %v1667_v46 = vpack.i.b16 %v1666_v3, %v1665_v9 }
 0x53d   : > { %3523 = vmatmul.mubr.msk.bf16.vlgmr.msra.gmra.mxu0 %vm1674_vm3, %v2132_v31  ;;  %3538 = vmatprep.subr.bf16.mxu1 %v3726_v17  ;;  %v1670_v31 = vpack.i.b16 %v1649_v45, %v1624_v23 }
 0x53e   : > { %3533 = vmatpush3.bf16.msra.mxu0 %v2282_v34  ;;  %3534 = vmatprep.mubr.msk.bf16.mxu0 %vm3727_vm2, %v3726_v17  ;;  %v2374_v24 = vsel %vm2142_vm4, %v1667_v46, 0 }
 0x53f   : > { %3544 = vmatprep.subr.bf16.mxu0 %v3726_v17 }
 0x551   : > { %v2102_v56 = vpop.xlane.xlu0 %2101 }
 0x552   : > { %3676 = vrcp.f32 %v2102_v56 }
 0x553   : > { %v2099_v58 = vpop.xlane.xlu1 %2098 }
 0x554   : > { %3678 = vrcp.f32 %v2099_v58 }
 0x555   : > { %v2105_v62 = vpop.xlane.xlu0 %2104 }
 0x556   : > { %3680 = vrcp.f32 %v2105_v62 }
 0x557   : > { %v2111_v6 = vpop.xlane.xlu1 %2110 }
 0x559   : > { %v2108_v1 = vpop.xlane.xlu0 %2107 }
 0x55a   : > { %3682 = vrcp.f32 %v2108_v1 }
 0x55d   : > { %v2114_v7 = vpop.xlane.xlu0 %2113 }
 0x55e   : > { %3684 = vrcp.f32 %v2114_v7 }
 0x55f   : > { %v3677_v44 = vpop.eup %3676  ;;  %3686 = vrcp.f32 %v2111_v6 }
 0x560   : > { %v2126_v10 = vmul.f32 %v3677_v44, %v4134_v12  ;;  %v2328_v12 = vsel %vm2142_vm4, %v1664_v20, 0 }
 0x561   : > { %v3679_v11 = vpop.eup %3678 }
 0x562   : > { %v2134_v14 = vpack.c.bf16 %v2126_v10, %v2126_v10  ;;  %v2125_v16 = vmul.f32 %v3679_v11, %v4136_v13  ;;  %v1671_v13 = vshrl.u32 %v1624_v23, 16 }
 0x563   : > { %v3681_v28 = vpop.eup %3680 }
 0x564   : > { %3535 = vmatmul.mubr.msk.bf16.vlgmr.msra.gmra.mxu0 %vm1674_vm3, %v2134_v14  ;;  %v2133_v26 = vpack.c.bf16 %v2125_v16, %v2125_v16  ;;  %v1673_v53 = vpack.i.b16 %v1672_v27, %v1671_v13  ;;  %v2127_v30 = vmul.f32 %v3681_v28, %v4140_v15 }
 0x565   : > { %3545 = vmatpush3.bf16.msra.mxu0 %v2374_v24  ;;  %3546 = vmatprep.mubr.msk.bf16.mxu0 %vm3727_vm2, %v3726_v17 }
 0x566   : > { %3529 = vmatmul.mubr.msk.bf16.vlgmr.msra.gmra.mxu1 %vm1674_vm3, %v2133_v26  ;;  %3556 = vmatprep.subr.bf16.mxu0 %v3726_v17  ;;  %v2466_v32 = vsel %vm2142_vm4, %v1673_v53, 0  ;;  %v2135_v34 = vpack.c.bf16 %v2127_v30, %v2127_v30 }
 0x567   : > { %v3683_v29 = vpop.eup %3682  ;;  %3539 = vmatpush3.bf16.msra.mxu1 %v2328_v12  ;;  %3540 = vmatprep.mubr.msk.bf16.mxu1 %vm3727_vm2, %v3726_v17 }
 0x568   : > { %v2128_v4 = vmul.f32 %v3683_v29, %v4148_v21  ;;  %3550 = vmatprep.subr.bf16.mxu1 %v3726_v17  ;;  %v2420_v21 = vsel %vm2142_vm4, %v1670_v31, 0 }
 0x56a   : > { %v2136_v55 = vpack.c.bf16 %v2128_v4, %v2128_v4 }
 0x56b   : > { %v3685_v22 = vpop.eup %3684 }
 0x56c   : > { %3547 = vmatmul.mubr.msk.bf16.vlgmr.msra.gmra.mxu0 %vm1674_vm3, %v2136_v55  ;;  %v3687_v37 = vpop.eup %3686  ;;  %v2130_v39 = vmul.f32 %v3685_v22, %v4154_v25 }
 0x56d   : > { %3557 = vmatpush3.bf16.msra.mxu0 %v2466_v32  ;;  %3558 = vmatprep.mubr.msk.bf16.mxu0 %vm3727_vm2, %v3726_v17  ;;  %v2129_v15 = vmul.f32 %v3687_v37, %v4144_v19 }
 0x56e   : > { %3541 = vmatmul.mubr.msk.bf16.vlgmr.msra.gmra.mxu1 %vm1674_vm3, %v2135_v34  ;;  %3570 = vmatprep.subr.bf16.mxu0 %v3726_v17  ;;  %v2138_v36 = vpack.c.bf16 %v2130_v39, %v2130_v39 }
 0x56f   : > { %3551 = vmatpush3.bf16.msra.mxu1 %v2420_v21  ;;  %3552 = vmatprep.mubr.msk.bf16.mxu1 %vm3727_vm2, %v3726_v17  ;;  %v2137_v38 = vpack.c.bf16 %v2129_v15, %v2129_v15 }
 0x570   : > { %3562 = vmatprep.subr.bf16.mxu1 %v3726_v17 }
 0x574   : > { %3559 = vmatmul.mubr.msk.bf16.vlgmr.msra.gmra.mxu0 %vm1674_vm3, %v2138_v36 }
 0x575   : > { %3574 = vmatprep.mubr.msk.bf16.mxu0 %vm3727_vm2, %v3726_v17 }
 0x576   : > { %3553 = vmatmul.mubr.msk.bf16.vlgmr.msra.gmra.mxu1 %vm1674_vm3, %v2137_v38 }
 0x577   : > { %3566 = vmatprep.mubr.msk.bf16.mxu1 %vm3727_vm2, %v3726_v17 }
 0x5fb   : > { %v2180_v25 = vpop.f32.mrf.mxu1 }
 0x5fd   : > { %v3518_v40 = vpop.f32.mrf.mxu1  ;;  %v2226_v41 = vpop.f32.mrf.mxu0 }
 0x5ff   : > { %v2183_v42 = vpop.f32.mrf.mxu1  ;;  %v3524_v61 = vpop.f32.mrf.mxu0 }
 0x601   : > { %v3519_v19 = vpop.f32.mrf.mxu1  ;;  %v2229_v18 = vpop.f32.mrf.mxu0 }
 0x603   : > { %v3525_v5 = vpop.f32.mrf.mxu0 }
 0x624   : > { %v2318_v33 = vpop.f32.mrf.mxu0 }
 0x625   : > { %v2524_v47 = vcombine.low %v2226_v41, %v2318_v33  ;;  %v2525_v48 = vcombine.high %v2226_v41, %v2318_v33 }
 0x626   : > { %v2272_v49 = vpop.f32.mrf.mxu1  ;;  %v3536_v35 = vpop.f32.mrf.mxu0 }
 0x627   : > { %v2508_v50 = vcombine.low %v2180_v25, %v2272_v49  ;;  %v2509_v51 = vcombine.high %v2180_v25, %v2272_v49  ;;  %v2532_v56 = vrot.slane %v2524_v47, %v3971_v60  ;;  %v2539_v43 = vrot.slane %v2525_v48, %v3971_v60 }
 0x628   : > { %v3530_v52 = vpop.f32.mrf.mxu1  ;;  %v2321_v54 = vpop.f32.mrf.mxu0 }
 0x629   : > { %v2516_v57 = vrot.slane %v2508_v50, %v3971_v60  ;;  %v2523_v58 = vrot.slane %v2509_v51, %v3971_v60 }
 0x62a   : > { %v2275_v59 = vpop.f32.mrf.mxu1  ;;  %v3537_v62 = vpop.f32.mrf.mxu0 }
 0x62b   : > { %v2540_v63 = vcombine.low %v2516_v57, %v2532_v56  ;;  %v2541_v0 = vcombine.high %v2516_v57, %v2532_v56  ;;  %v2556_v1 = vcombine.low %v2523_v58, %v2539_v43  ;;  %v2557_v2 = vcombine.high %v2523_v58, %v2539_v43  ;;  %v3644_v62 = vld [vmem:[%s4434_s24 + $0x8] sm:$0xff]  }
 0x62c   : > { %v3531_v3 = vpop.f32.mrf.mxu1  ;;  %v2410_v6 = vpop.f32.mrf.mxu0  ;;  %3563 = vmatpush3.bf16.msra.mxu1 %v3644_v62 }
 0x62d   : > { %v2548_v7 = vrot.slane %v2540_v63, %v3990_v8  ;;  %v2555_v9 = vrot.slane %v2541_v0, %v3990_v8  ;;  %v2564_v44 = vrot.slane %v2556_v1, %v3990_v8  ;;  %v2571_v10 = vrot.slane %v2557_v2, %v3990_v8  ;;  %3564 = vmatprep.subr.bf16.mxu1 %v3726_v17 }
 0x62e   : > { %v2364_v46 = vpop.f32.mrf.mxu1  ;;  %v3548_v45 = vpop.f32.mrf.mxu0 }
 0x62f   : > { %v2644_v11 = vcombine.low %v2548_v7, %v2555_v9  ;;  %v3380_v14 = vcombine.high %v2548_v7, %v2555_v9  ;;  %v2660_v16 = vcombine.low %v2564_v44, %v2571_v10  ;;  %v3381_v20 = vcombine.high %v2564_v44, %v2571_v10 }
 0x630   : > { %v3542_v23 = vpop.f32.mrf.mxu1  ;;  %v2413_v24 = vpop.f32.mrf.mxu0 }
 0x631   : > { %v2651_v26 = vrot.slane %v2644_v11, %v3971_v60  ;;  %v2659_v27 = vrot.slane %v3380_v14, %v3971_v60  ;;  %v2667_v28 = vrot.slane %v2660_v16, %v3971_v60  ;;  %v2675_v12 = vrot.slane %v3381_v20, %v3971_v60 }
 0x632   : > { %v2367_v13 = vpop.f32.mrf.mxu1  ;;  %v3549_v29 = vpop.f32.mrf.mxu0 }
 0x633   : > { %v2676_v4 = vcombine.low %v2651_v26, %v2659_v27  ;;  %v2692_v53 = vcombine.low %v2667_v28, %v2675_v12  ;;  %v2677_v54 = vcombine.high %v2651_v26, %v2659_v27  ;;  %v2693_v56 = vcombine.high %v2667_v28, %v2675_v12 }
 0x634   : > { %v3543_v30 = vpop.f32.mrf.mxu1  ;;  %v2502_v55 = vpop.f32.mrf.mxu0 }
 0x635   : > { %v2592_v31 = vcombine.low %v2410_v6, %v2502_v55  ;;  %v2593_v22 = vcombine.high %v2410_v6, %v2502_v55  ;;  %v4267_v37 = vrot.slane %v2676_v4, %v3990_v8  ;;  %v4270_v21 = vrot.slane %v2692_v53, %v3990_v8 }
 0x636   : > { %v2456_v32 = vpop.f32.mrf.mxu1  ;;  %v3560_v34 = vpop.f32.mrf.mxu0  ;;  %v2691_v3 = vrot.slane %v2677_v54, %v3990_v8  ;;  %v2707_v6 = vrot.slane %v2693_v56, %v3990_v8 }
 0x637   : > { %v2576_v39 = vcombine.low %v2364_v46, %v2456_v32  ;;  %v2577_v15 = vcombine.high %v2364_v46, %v2456_v32  ;;  %v2708_v25 = vcombine.low %v4267_v37, %v4270_v21  ;;  %v2600_v40 = vrot.slane %v2592_v31, %v3971_v60 }
 0x638   : > { %v3554_v36 = vpop.f32.mrf.mxu1  ;;  %v2505_v38 = vpop.f32.mrf.mxu0  ;;  %v2607_v41 = vrot.slane %v2593_v22, %v3971_v60  ;;  %v2710_v16 = vcombine.low %v2691_v3, %v2707_v6  ;;  %v2709_v23 = vcombine.high %v4267_v37, %v4270_v21  ;;  %v2711_v13 = vcombine.high %v2691_v3, %v2707_v6  ;;  %v3384_v37 = vld [vmem:[%s4435_s28] ss:$0 sm:$0xff] }
 0x639   : > { %v2584_v42 = vrot.slane %v2576_v39, %v3971_v60  ;;  %v2591_v61 = vrot.slane %v2577_v15, %v3971_v60 }
 0x63a   : > { %v2459_v19 = vpop.f32.mrf.mxu1  ;;  %v3561_v18 = vpop.f32.mrf.mxu0 }
 0x63b   : > { %v2608_v5 = vcombine.low %v2584_v42, %v2600_v40  ;;  %v2609_v33 = vcombine.high %v2584_v42, %v2600_v40  ;;  %v2624_v47 = vcombine.low %v2591_v61, %v2607_v41  ;;  %v2625_v48 = vcombine.high %v2591_v61, %v2607_v41  ;;  %v3696_v19 = vld [vmem:[%s4414_s15] sm:$0xff] }
 0x63c   : > { %v3555_v49 = vpop.f32.mrf.mxu1 }
 0x63d   : > { %v2616_v35 = vrot.slane %v2608_v5, %v3990_v8  ;;  %v2623_v50 = vrot.slane %v2609_v33, %v3990_v8  ;;  %v2632_v51 = vrot.slane %v2624_v47, %v3990_v8  ;;  %v2639_v52 = vrot.slane %v2625_v48, %v3990_v8  ;;  %v3697_v49 = vld [vmem:[%s4414_s15 + $0x8] sm:$0xff] }
 0x63f   : > { %v2712_v43 = vcombine.low %v2616_v35, %v2623_v50  ;;  %v3382_v57 = vcombine.high %v2616_v35, %v2623_v50  ;;  %v2728_v58 = vcombine.low %v2632_v51, %v2639_v52  ;;  %v3383_v59 = vcombine.high %v2632_v51, %v2639_v52 }
 0x641   : > { %v2719_v63 = vrot.slane %v2712_v43, %v3971_v60  ;;  %v2727_v0 = vrot.slane %v3382_v57, %v3971_v60  ;;  %v2735_v1 = vrot.slane %v2728_v58, %v3971_v60  ;;  %v2743_v2 = vrot.slane %v3383_v59, %v3971_v60  ;;  %v3645_v60 = vld [vmem:[%s4434_s24] sm:$0xff]  }
 0x642   : > { %3565 = vmatpush3.bf16.msra.mxu1 %v3645_v60 }
 0x643   : > { %v2745_v7 = vcombine.high %v2719_v63, %v2727_v0  ;;  %v2761_v9 = vcombine.high %v2735_v1, %v2743_v2  ;;  %v2744_v44 = vcombine.low %v2719_v63, %v2727_v0  ;;  %v2760_v10 = vcombine.low %v2735_v1, %v2743_v2  ;;  %3578 = vmatprep.subr.bf16.mxu1 %v3726_v17  ;;  %v3646_v0 = vld [vmem:[%s3881_s3 + $0x8] sm:$0xff]   ;;  %v3647_v1 = vld [vmem:[%s3881_s3] sm:$0xff]  }
 0x644   : > { %3571 = vmatpush3.bf16.msra.mxu0 %v3646_v0 }
 0x645   : > { %v2759_v46 = vrot.slane %v2745_v7, %v3990_v8  ;;  %v2775_v45 = vrot.slane %v2761_v9, %v3990_v8  ;;  %v2752_v11 = vrot.slane %v2744_v44, %v3990_v8  ;;  %v2768_v14 = vrot.slane %v2760_v10, %v3990_v8  ;;  %3572 = vmatprep.subr.bf16.mxu0 %v3726_v17 }
 0x647   : > { %v2778_v20 = vcombine.low %v2759_v46, %v2775_v45  ;;  %v2777_v24 = vcombine.high %v2752_v11, %v2768_v14  ;;  %v2776_v26 = vcombine.low %v2752_v11, %v2768_v14  ;;  %v2779_v12 = vcombine.high %v2759_v46, %v2775_v45  ;;  %v3388_v45 = vld [vmem:[%s676_s2] ss:$0 sm:$0xff] }
 0x648   : > { %3573 = vmatpush3.bf16.msra.mxu0 %v3647_v1 }
 0x649   : > { %v3632_v27 = vpack.i.bf16 %v2778_v20, %v2710_v16  ;;  %v3627_v28 = vpack.i.bf16 %v2777_v24, %v2709_v23  ;;  %v3637_v8 = vpack.i.bf16 %v2779_v12, %v2711_v13  ;;  %v3389_v16 = vld [vmem:[%s679_s17] ss:$0 sm:$0xff]  ;;  %v3650_v12 = vld [vmem:[%s3891_s26 + $0x8] sm:$0xff]  }
 0x64a   : > { %v3651_v13 = vld [vmem:[%s3891_s26] sm:$0xff]  }
 0x64b   : > { %3633 = vrot.lane.b32.xlu0 %v3632_v27, %s3736_s19  ;;  %3628 = vrot.lane.b32.xlu1 %v3627_v28, %s3737_s20  ;;  %v3648_v27 = vld [vmem:[%s3891_s26 + $0x18] sm:$0xff]   ;;  %v3649_v28 = vld [vmem:[%s3891_s26 + $0x10] sm:$0xff]  }
 0x64f   : > { %3638 = vrot.lane.b32.xlu1 %v3637_v8, %s3738_s14  ;;  %v3390_v8 = vld [vmem:[%s687_s5] ss:$0 sm:$0xff] }
 0x6bd   : > { %v3634_v29 = vpop.permute.xlu0 %3633  ;;  %v3629_v4 = vpop.permute.xlu1 %3628 }
 0x6be   : > { %v3631_v53 = vunpack.i.h.bf16 %v3629_v4  ;;  %v3630_v30 = vunpack.i.l.bf16 %v3629_v4  ;;  %v3636_v55 = vunpack.i.h.bf16 %v3634_v29  ;;  %v3635_v31 = vunpack.i.l.bf16 %v3634_v29 }
 0x6c0   : > { %v2804_v22 = vsel %vm1674_vm3, %v2708_v25, %v3630_v30  ;;  %v2805_v32 = vsel %vm1674_vm3, %v2776_v26, %v3631_v53 }
 0x6c1   : > { %v3639_v34 = vpop.permute.xlu1 %3638  ;;  %v2807_v36 = vsel %vm2806_vm5, %v2804_v22, %v3635_v31  ;;  %v2808_v38 = vsel %vm2806_vm5, %v2805_v32, %v3636_v55 }
 0x6c2   : > { %v3641_v39 = vunpack.i.h.bf16 %v3639_v34  ;;  %v3640_v15 = vunpack.i.l.bf16 %v3639_v34 }
 0x6c4   : > { %v2810_v40 = vsel %vm2809_vm6, %v2807_v36, %v3640_v15  ;;  %v2811_v41 = vsel %vm2809_vm6, %v2808_v38, %v3641_v39 }
 0x6c5   : > { %v2812_v42 = vpack.c.bf16 %v2811_v41, %v2810_v40 }
 0x6c7   : > { %3567 = vmatmul.mubr.msk.bf16.vlgmr.msra.gmra.mxu1 %vm716_vm1, %v2812_v42 }
 0x6c8   : > { %3586 = vmatprep.mubr.msk.bf16.mxu1 %vm3727_vm2, %v3726_v17  ;;  %3579 = vmatpush3.bf16.msra.mxu1 %v3648_v27 }
 0x6c9   : > { %3580 = vmatprep.subr.bf16.mxu1 %v3726_v17 }
 0x6cc   : > { %3581 = vmatpush3.bf16.msra.mxu1 %v3649_v28 }
 0x6cd   : > { %3582 = vmatprep.subr.bf16.mxu1 %v3726_v17 }
 0x6d0   : > { %3583 = vmatpush3.bf16.msra.mxu1 %v3650_v12 }
 0x6d1   : > { %3584 = vmatprep.subr.bf16.mxu1 %v3726_v17 }
 0x6d4   : > { %3585 = vmatpush3.bf16.msra.mxu1 %v3651_v13 }
 0x787   : > { %v2873_v21 = vpop.f32.mrf.mxu1 }
 0x788   : > { %v2874_v25 = vadd.f32 %v3384_v37, %v2873_v21 }
 0x789   : > { %v3568_v61 = vpop.f32.mrf.mxu1 }
 0x78a   : > { %v4314_v18 = vadd.f32 %v3696_v19, %v2874_v25 }
 0x78b   : > { %v2876_v5 = vpop.f32.mrf.mxu1 }
 0x78c   : > { %v2877_v33 = vadd.f32 %v3384_v37, %v2876_v5  ;;  %v2884_v47 = vsel %vm716_vm1, %v4314_v18, 0.0  ;;  %v3394_v37 = vld [vmem:[%s695_s30] ss:$0 sm:$0xff] }
 0x78d   : > { %2885 = vadd.xlane.f32.xlu1 %v2884_v47  ;;  %v3569_v48 = vpop.f32.mrf.mxu1 }
 0x78e   : > { %v4321_v35 = vadd.f32 %v3697_v49, %v2877_v33 }
 0x790   : > { %v2887_v50 = vsel %vm716_vm1, %v4321_v35, 0.0 }
 0x791   : > { %2888 = vadd.xlane.f32.xlu0 %v2887_v50 }
 0x816   : > { %v2886_v51 = vpop.xlane.xlu1 %2885 }
 0x817   : > { %v2890_v52 = vmul.f32 0.03125, %v2886_v51 }
 0x819   : > { %v2892_v54 = vsub.f32 %v4314_v18, %v2890_v52 }
 0x81a   : > { %v2889_v56 = vpop.xlane.xlu0 %2888 }
 0x81b   : > { %v2891_v43 = vmul.f32 0.03125, %v2889_v56  ;;  %v2894_v57 = vmul.f32 %v2892_v54, %v2892_v54 }
 0x81d   : > { %v2893_v58 = vsub.f32 %v4321_v35, %v2891_v43  ;;  %v2896_v59 = vsel %vm716_vm1, %v2894_v57, 0.0 }
 0x81e   : > { %2897 = vadd.xlane.f32.xlu0 %v2896_v59 }
 0x81f   : > { %v2895_v62 = vmul.f32 %v2893_v58, %v2893_v58 }
 0x821   : > { %v2899_v63 = vsel %vm716_vm1, %v2895_v62, 0.0 }
 0x822   : > { %2900 = vadd.xlane.f32.xlu1 %v2899_v63 }
 0x8a7   : > { %v2898_v2 = vpop.xlane.xlu0 %2897 }
 0x8a8   : > { %v2902_v3 = vmul.f32 0.03125, %v2898_v2 }
 0x8aa   : > { %v2904_v6 = vadd.f32 1e-06, %v2902_v3 }
 0x8ab   : > { %v2901_v7 = vpop.xlane.xlu1 %2900 }
 0x8ac   : > { %3688 = vrsqrt.f32 %v2904_v6  ;;  %v2903_v9 = vmul.f32 0.03125, %v2901_v7 }
 0x8ae   : > { %v2905_v44 = vadd.f32 1e-06, %v2903_v9 }
 0x8b0   : > { %3690 = vrsqrt.f32 %v2905_v44 }
 0x8b9   : > { %v3689_v10 = vpop.eup %3688 }
 0x8ba   : > { %v2908_v46 = vmul.f32 %v3689_v10, %v2892_v54 }
 0x8bc   : > { %v2916_v60 = vmul.f32 %v3388_v45, %v2908_v46 }
 0x8bd   : > { %v3691_v11 = vpop.eup %3690 }
 0x8be   : > { %v2909_v14 = vmul.f32 %v3691_v11, %v2893_v58  ;;  %v2924_v23 = vadd.f32 %v3389_v16, %v2916_v60 }
 0x8c0   : > { %v2917_v20 = vmul.f32 %v3388_v45, %v2909_v14 }
 0x8c2   : > { %v2925_v24 = vadd.f32 %v3389_v16, %v2917_v20 }
 0x8c4   : > { %v2926_v26 = vpack.c.bf16 %v2925_v24, %v2924_v23 }
 0x8c6   : > { %3575 = vmatmul.mubr.msk.bf16.vlgmr.msra.gmra.mxu0 %vm716_vm1, %v2926_v26 }
 0x986   : > { %v2987_v29 = vpop.f32.mrf.mxu0 }
 0x987   : > { %v2988_v4 = vadd.f32 %v3390_v8, %v2987_v29 }
 0x988   : > { %v3576_v53 = vpop.f32.mrf.mxu0 }
 0x989   : > { %v2996_v30 = vmul.f32 0.70710677, %v2988_v4  ;;  %v2994_v15 = vmul.f32 0.5, %v2988_v4 }
 0x98a   : > { %v2990_v55 = vpop.f32.mrf.mxu0 }
 0x98b   : > { %3692 = verf.f32 %v2996_v30  ;;  %v2991_v31 = vadd.f32 %v3390_v8, %v2990_v55 }
 0x98c   : > { %v3577_v22 = vpop.f32.mrf.mxu0 }
 0x98d   : > { %v2997_v32 = vmul.f32 0.70710677, %v2991_v31  ;;  %v2995_v36 = vmul.f32 0.5, %v2991_v31 }
 0x98f   : > { %3694 = verf.f32 %v2997_v32 }
 0x998   : > { %v3693_v34 = vpop.eup %3692 }
 0x999   : > { %v3000_v17 = vadd.f32 1.0, %v3693_v34 }
 0x99b   : > { %v3002_v40 = vmul.f32 %v3000_v17, %v2994_v15 }
 0x99c   : > { %v3695_v39 = vpop.eup %3694 }
 0x99d   : > { %v3001_v38 = vadd.f32 1.0, %v3695_v39 }
 0x99f   : > { %v3003_v41 = vmul.f32 %v3001_v38, %v2995_v36 }
 0x9a1   : > { %v3004_v42 = vpack.c.bf16 %v3003_v41, %v3002_v40 }
 0x9a3   : > { %3587 = vmatmul.mubr.msk.bf16.vlgmr.msra.gmra.mxu1 %vm3044_vm7, %v3004_v42 }
 0xa63   : > { %v3082_v21 = vpop.f32.mrf.mxu1 }
 0xa64   : > { %v3083_v25 = vadd.f32 %v3394_v37, %v3082_v21 }
 0xa65   : > { %v3588_v61 = vpop.f32.mrf.mxu1 }
 0xa66   : > { %v3089_v19 = vadd.f32 %v3083_v25, %v4314_v18  ;;  %3094 = sbr.rel (%p3400_p6) target bundleno = 2669 (0xa6d), region = 88 }
 0xa67   : > { %v3085_v5 = vpop.f32.mrf.mxu1 }
 0xa68   : > { %v3086_v33 = vadd.f32 %v3394_v37, %v3085_v5 }
 0xa69   : > { %v3589_v47 = vpop.f32.mrf.mxu1 }
 0xa6a   : > { %v3090_v48 = vadd.f32 %v3086_v33, %v4321_v35 }
 0xa6b   : > { %3095 = vst.msk [vmem:[%s4414_s15] sm:$0xff] %vm716_vm1, %v3089_v19 }
 0xa6c   : > { %3096 = vst.msk [vmem:[%s4414_s15 + $0x8] sm:$0xff] %vm716_vm1, %v3090_v48 }
 0xa6d PF: > { %p3401_p7 = scmp.ne.s32.totalorder %s3716_s18, 1 }
 0xa6e   : > { %s4436_s25 = sld [smem:[#allocation9_spill]] (!%p3401_p7) }
 0xa6f   : > { %3100 = sbr.rel (%p3401_p7) target bundleno = 2989 (0xbad), region = 92  ;;  %s4437_s16 = sld [smem:[#allocation10_spill]] (!%p3401_p7) }
 0xa74   : > { %v3103_v18 = vsel %vm716_vm1, %v3089_v19, 0.0  ;;  %v3106_v49 = vsel %vm716_vm1, %v3090_v48, 0.0  ;;  %v3402_v7 = vld [vmem:[%s4436_s25] ss:$0 sm:$0xff] }
 0xa75   : > { %3104 = vadd.xlane.f32.xlu0 %v3103_v18  ;;  %v3403_v44 = vld [vmem:[%s4437_s16] ss:$0 sm:$0xff] }
 0xa79   : > { %3107 = vadd.xlane.f32.xlu0 %v3106_v49 }
 0xafe   : > { %v3105_v35 = vpop.xlane.xlu0 %3104 }
 0xaff   : > { %v3109_v50 = vmul.f32 0.03125, %v3105_v35 }
 0xb01   : > { %v3111_v51 = vsub.f32 %v3089_v19, %v3109_v50 }
 0xb02   : > { %v3108_v52 = vpop.xlane.xlu0 %3107 }
 0xb03   : > { %v3110_v54 = vmul.f32 0.03125, %v3108_v52  ;;  %v3113_v56 = vmul.f32 %v3111_v51, %v3111_v51 }
 0xb05   : > { %v3112_v43 = vsub.f32 %v3090_v48, %v3110_v54  ;;  %v3115_v57 = vsel %vm716_vm1, %v3113_v56, 0.0 }
 0xb06   : > { %3116 = vadd.xlane.f32.xlu1 %v3115_v57 }
 0xb07   : > { %v3114_v58 = vmul.f32 %v3112_v43, %v3112_v43 }
 0xb09   : > { %v3118_v59 = vsel %vm716_vm1, %v3114_v58, 0.0 }
 0xb0a   : > { %3119 = vadd.xlane.f32.xlu1 %v3118_v59 }
 0xb8f   : > { %v3117_v62 = vpop.xlane.xlu1 %3116 }
 0xb90   : > { %v3121_v63 = vmul.f32 0.03125, %v3117_v62 }
 0xb92   : > { %v3123_v0 = vadd.f32 1e-06, %v3121_v63 }
 0xb93   : > { %v3120_v1 = vpop.xlane.xlu1 %3119 }
 0xb94   : > { %3698 = vrsqrt.f32 %v3123_v0  ;;  %v3122_v2 = vmul.f32 0.03125, %v3120_v1 }
 0xb96   : > { %v3124_v3 = vadd.f32 1e-06, %v3122_v2 }
 0xb98   : > { %3700 = vrsqrt.f32 %v3124_v3 }
 0xba1   : > { %v3699_v6 = vpop.eup %3698 }
 0xba2   : > { %v3127_v9 = vmul.f32 %v3699_v6, %v3111_v51 }
 0xba4   : > { %v3135_v10 = vmul.f32 %v3402_v7, %v3127_v9 }
 0xba5   : > { %v3701_v46 = vpop.eup %3700 }
 0xba6   : > { %v3143_v45 = vadd.f32 %v3403_v44, %v3135_v10  ;;  %v3128_v11 = vmul.f32 %v3701_v46, %v3112_v43 }
 0xba8   : > { %3145 = vst.msk [vmem:[%s4414_s15] sm:$0xff] %vm716_vm1, %v3143_v45  ;;  %v3136_v14 = vmul.f32 %v3402_v7, %v3128_v11 }
 0xbaa   : > { %v3144_v60 = vadd.f32 %v3403_v44, %v3136_v14 }
 0xbac   : > { %3146 = vst.msk [vmem:[%s4414_s15 + $0x8] sm:$0xff] %vm716_vm1, %v3144_v60 }
 0xbad PF: > { %s4438_s3 = sld [smem:[#allocation3_spill]] }
 0xbae   : > { %s4439_s18 = sld [smem:[#allocation2_spill]] }
 0xbaf   : > { %s4440_s19 = sld [smem:[#allocation4_spill]] }
 0xbb3   : > { %s25_s20 = sadd.s32 1, %s4438_s3  }
 0xbb4   : > { %p22_p8 = scmp.ge.s32.totalorder %s25_s20, 4  }
 0xbb6   :  { %24 = sbr.rel (!%p22_p8) target bundleno = 6 (0x6), region = 158 }

</bundles_post_ra>
